<compile_context>
chip_gen: v6e
topology: v6e:2x2x1
jax: 0.10.0
libtpu: 0.0.40
codegen_flags: <defaults>
</compile_context>

<pallas_src>
import jax
import jax.numpy as jnp
from jax import lax
from jax.experimental import pallas as pl
from jax.experimental.pallas import tpu as pltpu


def _scale_matmul_kernel(x_ref, scale_ref, w_ref, o_ref):
    # x_ref:     (R, Cin)  f32, resident across all Cout tiles
    # scale_ref: (1, Cin)  f32, resident (row broadcast)
    # w_ref:     (TN, Cin) bf16, streamed Cout tile of the PyTorch-layout weight
    # o_ref:     (R, TN)   f32, lane-dense output tile
    xs = (x_ref[...] * scale_ref[...]).astype(jnp.bfloat16)          # VPU mul + cast
    # out = xs @ w^T : contract the Cin axis of both operands on the MXU, f32 accumulate.
    o_ref[...] = lax.dot_general(
        xs, w_ref[...],
        dimension_numbers=(((1,), (1,)), ((), ())),
        preferred_element_type=jnp.float32)


def _pick_cout_tile(cout):
    """Lane-aligned (multiple-of-128) Cout tile, chip-aware."""
    if cout <= 512:
        return cout                       # single full tile (always legal)
    kind = ""
    try:
        kind = jax.devices()[0].device_kind.lower()
    except Exception:
        pass
    if "v7" in kind:
        # Two TensorCores: prefer an even tile count (balanced split, >=2 tiles
        # per core so the weight DMA pipelines against the matmul).
        for tn in (384, 256, 512, 128):
            if pl.cdiv(cout, tn) % 2 == 0:
                return tn
        return 384
    # Single TensorCore (v5e/v6e): fewest lane-aligned tiles -> least per-step
    # overhead while still double-buffering the weight stream.
    return 512


def fused_scale_conv1x1(x_nchw, scale_nc11, weight_oi11):
    """Conv2d(1x1, bias=False)(scale * x), matching the PyTorch module forward."""
    N, Cin, H, W = x_nchw.shape
    Cout = weight_oi11.shape[0]
    R = N * H * W

    # Cheap wrapper layout plumbing (~300 KB arrays): channels-last 2-D views.
    x_rc = jnp.transpose(x_nchw.reshape(N, Cin, H * W), (0, 2, 1)).reshape(R, Cin)
    scale_1c = scale_nc11.reshape(1, Cin)
    # bf16 weight stream: halves HBM traffic on v5e/v6e and runs the MXU at its
    # native bf16 rate on v7x; accumulation stays f32 inside the kernel.
    w_oc = weight_oi11.reshape(Cout, Cin).astype(jnp.bfloat16)
    # TODO(synk): in a real model the bf16 weight cast would be done once at load time,
    # not per forward call.

    TN = _pick_cout_tile(Cout)
    grid = (pl.cdiv(Cout, TN),)

    out_rc = pl.pallas_call(
        _scale_matmul_kernel,
        out_shape=jax.ShapeDtypeStruct((R, Cout), jnp.float32),
        grid_spec=pltpu.PrefetchScalarGridSpec(
            num_scalar_prefetch=0,
            grid=grid,
            in_specs=[
                pl.BlockSpec((R, Cin), lambda j: (0, 0)),      # x: resident
                pl.BlockSpec((1, Cin), lambda j: (0, 0)),      # scale: resident
                pl.BlockSpec((TN, Cin), lambda j: (j, 0)),     # weight: streamed
            ],
            out_specs=pl.BlockSpec((R, TN), lambda j: (0, j)), # lane-dense tile
        ),
        compiler_params=pltpu.CompilerParams(
            dimension_semantics=("parallel",),   # disjoint Cout tiles (megacore-shardable)
            vmem_limit_bytes=32 << 20,           # ~4-5 MiB live incl. double buffers
        ),
    )(x_rc, scale_1c, w_oc)

    # (R, Cout) -> (N, Cout, H, W)
    return jnp.transpose(out_rc.reshape(N, H * W, Cout), (0, 2, 1)).reshape(
        N, Cout, H, W)


if __name__ == "__main__":
    key = jax.random.PRNGKey(0)
    k1, k2, k3 = jax.random.split(key, 3)

    # Shapes implied by the module: 1x1512x7x7 input, Conv2d(1512, 1512, 1x1).
    N, C, H, W = 1, 1512, 7, 7
    x337 = jax.random.normal(k1, (N, C, H, W), dtype=jnp.float32)
    x342 = jax.random.normal(k2, (1, C, 1, 1), dtype=jnp.float32)
    weight = jax.random.normal(k3, (C, C, 1, 1), dtype=jnp.float32) * (1.0 / C ** 0.5)

    fn = jax.jit(fused_scale_conv1x1)
    out = jax.block_until_ready(fn(x337, x342, weight))

    # Reference with the SAME bf16 rounding of the streamed operands (kernel keeps
    # f32 accumulation), so only accumulation order differs.
    xs_bf = (x342 * x337).astype(jnp.bfloat16).astype(jnp.float32)
    w_bf = weight[:, :, 0, 0].astype(jnp.bfloat16).astype(jnp.float32)
    ref = jnp.einsum('nihw,oi->nohw', xs_bf, w_bf,
                     precision=jax.lax.Precision.HIGHEST)

    assert out.shape == (N, C, H, W)
    assert jnp.allclose(out, ref, atol=5e-3, rtol=5e-3), "mismatch vs reference"

    print("KERNEL_OK")
</pallas_src>

<mosaic_0001>
module attributes {stable_mosaic.version = 11 : i64} {
  func.func @_scale_matmul_kernel(%arg0: i32, %arg1: memref<49x1512xf32, #tpu.memory_space<vmem>>, %arg2: memref<1x1512xf32, #tpu.memory_space<vmem>>, %arg3: memref<512x1512xbf16, #tpu.memory_space<vmem>>, %arg4: memref<49x512xf32, #tpu.memory_space<vmem>>) attributes {dimension_semantics = [#tpu.dimension_semantics<parallel>], iteration_bounds = array<i64: 3>, scalar_prefetch = 0 : i64, scratch_operands = 0 : i64, tpu.core_type = #tpu.core_type<tc>, window_params = [{pipeline_mode = #tpu.pipeline_mode<synchronous>, transform_indices = @transform_0, window_bounds = array<i64: 49, 1512>}, {pipeline_mode = #tpu.pipeline_mode<synchronous>, transform_indices = @transform_1, window_bounds = array<i64: 1, 1512>}, {transform_indices = @transform_2, window_bounds = array<i64: 512, 1512>}, {transform_indices = @transform_3, window_bounds = array<i64: 49, 512>}]} {
    %c0 = arith.constant 0 : index
    %c0_0 = arith.constant 0 : index
    %0 = vector.load %arg1[%c0, %c0_0] : memref<49x1512xf32, #tpu.memory_space<vmem>>, vector<49x1512xf32>
    %c0_1 = arith.constant 0 : index
    %c0_2 = arith.constant 0 : index
    %1 = vector.load %arg2[%c0_1, %c0_2] : memref<1x1512xf32, #tpu.memory_space<vmem>>, vector<1x1512xf32>
    %2 = vector.broadcast %1 : vector<1x1512xf32> to vector<49x1512xf32>
    %3 = arith.mulf %0, %2 : vector<49x1512xf32>
    %4 = arith.truncf %3 : vector<49x1512xf32> to vector<49x1512xbf16>
    %c0_3 = arith.constant 0 : index
    %c0_4 = arith.constant 0 : index
    %5 = vector.load %arg3[%c0_3, %c0_4] : memref<512x1512xbf16, #tpu.memory_space<vmem>>, vector<512x1512xbf16>
    %cst = arith.constant dense<0.000000e+00> : vector<49x512xf32>
    %6 = tpu.matmul %4, %5, %cst {dimension_numbers = #tpu.dot_dimension_numbers<[1], [1], [0], [0], [0, 0, 1, 0], [], []>} : vector<49x1512xbf16>, vector<512x1512xbf16>, vector<49x512xf32> -> vector<49x512xf32>
    %c0_5 = arith.constant 0 : index
    %c0_6 = arith.constant 0 : index
    %7 = vector.load %arg4[%c0_5, %c0_6] : memref<49x512xf32, #tpu.memory_space<vmem>>, vector<49x512xf32>
    tpu.vector_store %arg4[%c0_5, %c0_6], %6 {strides = array<i32>} : memref<49x512xf32, #tpu.memory_space<vmem>>, vector<49x512xf32>,
    return
  }
  func.func @transform_0(%arg0: i32) -> (i32, i32) {
    %c0_i32 = arith.constant 0 : i32
    %c0_i32_0 = arith.constant 0 : i32
    %c0_i32_1 = arith.constant 0 : i32
    return %c0_i32, %c0_i32_0 : i32, i32
  }
  func.func @transform_1(%arg0: i32) -> (i32, i32) {
    %c0_i32 = arith.constant 0 : i32
    %c0_i32_0 = arith.constant 0 : i32
    %c0_i32_1 = arith.constant 0 : i32
    return %c0_i32, %c0_i32_0 : i32, i32
  }
  func.func @transform_2(%arg0: i32) -> (i32, i32) {
    %c0_i32 = arith.constant 0 : i32
    %c0_i32_0 = arith.constant 0 : i32
    return %arg0, %c0_i32 : i32, i32
  }
  func.func @transform_3(%arg0: i32) -> (i32, i32) {
    %c0_i32 = arith.constant 0 : i32
    %c0_i32_0 = arith.constant 0 : i32
    return %c0_i32, %arg0 : i32, i32
  }
}

</mosaic_0001>

<bundles_post_ra>
// kernel: fused_scale_conv1x1.1
= control target key start
LH: loop header
LB: loop body
LE: loop exit
PB: predicated region body
PF: predicated region fallthrough
CT: control target
= control target key end

     0   :  { %s4951_s12 = smov 0   ;;  %s4953_s13 = smov 0   ;;  %s6260_s0 = inlined_call_operand.vmem [shape: f32[49,1512], index: 0, kind: input, shape index: {}]   ;;  %s6261_s1 = inlined_call_operand.vmem [shape: f32[1,1512], index: 1, kind: input, shape index: {}]   ;;  %s6262_s2 = inlined_call_operand.vmem [shape: bf16[1512,1512], index: 2, kind: input, shape index: {}]   ;;  %s6263_s3 = inlined_call_operand.vmem [shape: f32[49,1512], index: 3, kind: output, shape index: {}]  }
   0x1   :  { %s4955_s14 = smov 0  }
   0x2 LB: > { %s4964_s15 = sadd.s32 4294967295, %s4929_s14   ;;  %s4966_s16 = sadd.s32 1, %s4929_s14   ;;  %s4929_s14 = sphi %s4955_s14, %s6313_s14   ;;  %s4925_s13 = sphi %s4953_s13, %s6312_s13   ;;  %s4921_s12 = sphi %s4951_s12, %s6311_s12  }
   0x3   : > { %s85_s17 = ssub.s32 %s4929_s14, %s4966_s16  ;;  %s88_s18 = sadd.s32 1, %s4925_s13 }
   0x4   : > { %p86_p0 = scmp.eq.s32.totalorder %s85_s17, 0  ;;  %p98_p1 = scmp.ne.s32.totalorder %s4925_s13, %s4921_s12 }
   0x5   : > { %p99_p2 = scmp.eq.s32.totalorder %s4964_s15, 2  ;;  %p3872_p3 = scmp.ge.s32.totalorder %s4929_s14, 1 }
   0x6   : > { %s4974_s19 = scalar_select %p86_p0, %s4925_s13, %s88_s18  }
   0x7   : > { %p4976_p4 = por %p99_p2, %p98_p1  ;;  %p149_p5 = scmp.lt.s32.totalorder %s4929_s14, 4 }
   0x9   : > { %p150_p6 = pnand %p3872_p3, %p149_p5 }
   0xb   : > { %153 = sbr.rel (%p150_p6) target bundleno = 1024 (0x400), region = 32 }
  0x10   : > { %s3873_s21 = sshll.u32 %s4964_s15, 6  ;;  %v284_v0 = vlaneseq  ;;  %v4986_v2 = vld [vmem:[%s6261_s1] sm:$0xff]  ;;  %v197_v3 = vld [vmem:[%s6260_s0 + $0x8] sm:$0xff]  ;;  %v199_v7 = vld [vmem:[%s6260_s0 + $0x18] sm:$0xff]  ;;  %vm2748_vm0 = vcmask 850944   ;;  %s175_s17 = sand.u32 1, %s4921_s12  }
  0x11   : > { %p184_p7 = scmp.lt.s32.totalorder %s3873_s21, 188  ;;  %v209_v6 = vld [vmem:[%s6260_s0 + $0x68] sm:$0xff]  ;;  %v211_v8 = vld [vmem:[%s6260_s0 + $0x78] sm:$0xff]  ;;  %s4304_s18 = smul.u32 224, %s175_s17 }
  0x12   : > { %v4981_v1 = vshrl.u32 %v284_v0, 7 }
  0x13   : > { %s6315_s21 = smov (!%p184_p7, %s3873_s21), 188  ;;  %s5944_s12 = scalar_lea.vmem [#allocation2], %s4304_s18 }
  0x14   : > { %v290_v4 = vsub.s32 1, %v4981_v1  ;;  %v298_v5 = vsub.s32 3, %v4981_v1  ;;  %s4305_s26 = smul.u32 48, %s6315_s21 }
  0x16   : > { %v5005_v9 = vrot.slane %v4986_v2, %v290_v4  ;;  %v5010_v10 = vrot.slane %v4986_v2, %v298_v5  ;;  %s5015_s8 = scalar_lea.vmem %s6262_s2, %s4305_s26 }
  0x17   : > { %v4330_v11 = vld [vmem:[%s5015_s8 + $0x2a4] ss:$48 sps:$4 sm:$0xff]   ;;  %v4332_v16 = vld [vmem:[%s5015_s8 + $0x2ac] ss:$48 sps:$4 sm:$0xff]   ;;  %v4334_v17 = vld [vmem:[%s5015_s8 + $0x2a0] ss:$48 sps:$4 sm:$0xff]  }
  0x18   : > { %v345_v12 = vmul.f32 %v5005_v9, %v197_v3  ;;  %v357_v13 = vmul.f32 %v5005_v9, %v209_v6  ;;  %v347_v14 = vmul.f32 %v5010_v10, %v199_v7  ;;  %v359_v15 = vmul.f32 %v5010_v10, %v211_v8  ;;  %2857 = vmatprep.subr.bf16.mxu0 %v4330_v11  ;;  %v4335_v18 = vld [vmem:[%s5015_s8 + $0x2a8] ss:$48 sps:$4 sm:$0xff]   ;;  %v4336_v21 = vld [vmem:[%s5015_s8 + $0x244] ss:$48 sps:$4 sm:$0xff]   ;;  %v4338_v22 = vld [vmem:[%s5015_s8 + $0x24c] ss:$48 sps:$4 sm:$0xff]  }
  0x19   : > { %2928 = vmatprep.subr.bf16.mxu1 %v4332_v16  ;;  %2858 = vmatpush1.bf16.xpose.msra.mxu0 %v4334_v17  ;;  %v4340_v23 = vld [vmem:[%s5015_s8 + $0x240] ss:$48 sps:$4 sm:$0xff]   ;;  %v4341_v24 = vld [vmem:[%s5015_s8 + $0x248] ss:$48 sps:$4 sm:$0xff]   ;;  %v4342_v25 = vld [vmem:[%s5015_s8 + $0x1e4] ss:$48 sps:$4 sm:$0xff]  }
  0x1a   : > { %v5025_v19 = vpack.c.bf16 %v357_v13, %v345_v12  ;;  %v5027_v20 = vpack.c.bf16 %v359_v15, %v347_v14  ;;  %2929 = vmatpush1.bf16.xpose.msra.mxu1 %v4335_v18  ;;  %2859 = vmatprep.subr.bf16.mxu0 %v4336_v21  ;;  %v4344_v26 = vld [vmem:[%s5015_s8 + $0x1ec] ss:$48 sps:$4 sm:$0xff]   ;;  %v4346_v27 = vld [vmem:[%s5015_s8 + $0x1e0] ss:$48 sps:$4 sm:$0xff]   ;;  %v4347_v28 = vld [vmem:[%s5015_s8 + $0x1e8] ss:$48 sps:$4 sm:$0xff]  }
  0x1b   : > { %2930 = vmatprep.subr.bf16.mxu1 %v4338_v22  ;;  %v4348_v29 = vld [vmem:[%s5015_s8 + $0x184] ss:$48 sps:$4 sm:$0xff]   ;;  %v4350_v30 = vld [vmem:[%s5015_s8 + $0x18c] ss:$48 sps:$4 sm:$0xff]   ;;  %v4352_v31 = vld [vmem:[%s5015_s8 + $0x180] ss:$48 sps:$4 sm:$0xff]  }
  0x1c   : > { %2889 = vmatprep.mubr.bf16.mxu0 %v5025_v19  ;;  %2960 = vmatprep.mubr.bf16.mxu1 %v5027_v20  ;;  %v4353_v32 = vld [vmem:[%s5015_s8 + $0x188] ss:$48 sps:$4 sm:$0xff]   ;;  %v4354_v33 = vld [vmem:[%s5015_s8 + $0x124] ss:$48 sps:$4 sm:$0xff]   ;;  %v4356_v34 = vld [vmem:[%s5015_s8 + $0x12c] ss:$48 sps:$4 sm:$0xff]  }
  0x1d   : > { %v4358_v35 = vld [vmem:[%s5015_s8 + $0x120] ss:$48 sps:$4 sm:$0xff]   ;;  %v4359_v36 = vld [vmem:[%s5015_s8 + $0x128] ss:$48 sps:$4 sm:$0xff]   ;;  %v4360_v37 = vld [vmem:[%s5015_s8 + $0xc4] ss:$48 sps:$4 sm:$0xff]  }
  0x1e   : > { %v4362_v38 = vld [vmem:[%s5015_s8 + $0xcc] ss:$48 sps:$4 sm:$0xff]   ;;  %v4364_v39 = vld [vmem:[%s5015_s8 + $0xc0] ss:$48 sps:$4 sm:$0xff]   ;;  %v4365_v40 = vld [vmem:[%s5015_s8 + $0xc8] ss:$48 sps:$4 sm:$0xff]  }
  0x1f   : > { %v4366_v41 = vld [vmem:[%s5015_s8 + $0x64] ss:$48 sps:$4 sm:$0xff]   ;;  %v4368_v42 = vld [vmem:[%s5015_s8 + $0x6c] ss:$48 sps:$4 sm:$0xff]   ;;  %v4370_v43 = vld [vmem:[%s5015_s8 + $0x60] ss:$48 sps:$4 sm:$0xff]  }
  0x20   : > { %v4371_v44 = vld [vmem:[%s5015_s8 + $0x68] ss:$48 sps:$4 sm:$0xff]   ;;  %v4372_v45 = vld [vmem:[%s5015_s8 + $0x4] ss:$48 sps:$4 sm:$0xff]   ;;  %v4374_v46 = vld [vmem:[%s5015_s8 + $0xc] ss:$48 sps:$4 sm:$0xff]  }
  0x21   : > { %2860 = vmatpush1.bf16.xpose.msra.mxu0 %v4340_v23  ;;  %v4376_v47 = vld [vmem:[%s5015_s8] ss:$48 sps:$4 sm:$0xff]   ;;  %v4377_v48 = vld [vmem:[%s5015_s8 + $0x8] ss:$48 sps:$4 sm:$0xff]   ;;  %v4378_v49 = vld [vmem:[%s5015_s8 + $0x5a4] ss:$48 sps:$4 sm:$0xff]  }
  0x22   : > { %2931 = vmatpush1.bf16.xpose.msra.mxu1 %v4341_v24  ;;  %2861 = vmatprep.subr.bf16.mxu0 %v4342_v25  ;;  %v4380_v50 = vld [vmem:[%s5015_s8 + $0x5ac] ss:$48 sps:$4 sm:$0xff]   ;;  %v4382_v51 = vld [vmem:[%s5015_s8 + $0x5a0] ss:$48 sps:$4 sm:$0xff]   ;;  %v4383_v52 = vld [vmem:[%s5015_s8 + $0x5a8] ss:$48 sps:$4 sm:$0xff]  }
  0x23   : > { %2932 = vmatprep.subr.bf16.mxu1 %v4344_v26  ;;  %v4384_v53 = vld [vmem:[%s5015_s8 + $0x544] ss:$48 sps:$4 sm:$0xff]   ;;  %v4386_v54 = vld [vmem:[%s5015_s8 + $0x54c] ss:$48 sps:$4 sm:$0xff]   ;;  %v4388_v55 = vld [vmem:[%s5015_s8 + $0x540] ss:$48 sps:$4 sm:$0xff]  }
  0x24   : > { %v4389_v56 = vld [vmem:[%s5015_s8 + $0x548] ss:$48 sps:$4 sm:$0xff]   ;;  %v4390_v57 = vld [vmem:[%s5015_s8 + $0x4e4] ss:$48 sps:$4 sm:$0xff]   ;;  %v4392_v58 = vld [vmem:[%s5015_s8 + $0x4ec] ss:$48 sps:$4 sm:$0xff]  }
  0x25   : > { %v4394_v59 = vld [vmem:[%s5015_s8 + $0x4e0] ss:$48 sps:$4 sm:$0xff]   ;;  %v4395_v60 = vld [vmem:[%s5015_s8 + $0x4e8] ss:$48 sps:$4 sm:$0xff]   ;;  %v4396_v61 = vld [vmem:[%s5015_s8 + $0x484] ss:$48 sps:$4 sm:$0xff]  }
  0x26   : > { %v4398_v62 = vld [vmem:[%s5015_s8 + $0x48c] ss:$48 sps:$4 sm:$0xff]   ;;  %v4400_v63 = vld [vmem:[%s5015_s8 + $0x480] ss:$48 sps:$4 sm:$0xff]   ;;  %v4401_v0 = vld [vmem:[%s5015_s8 + $0x488] ss:$48 sps:$4 sm:$0xff]  }
  0x27   : > { %v4402_v3 = vld [vmem:[%s5015_s8 + $0x424] ss:$48 sps:$4 sm:$0xff]   ;;  %v4404_v6 = vld [vmem:[%s5015_s8 + $0x42c] ss:$48 sps:$4 sm:$0xff]   ;;  %v4406_v7 = vld [vmem:[%s5015_s8 + $0x420] ss:$48 sps:$4 sm:$0xff]  }
  0x28   : > { %v4407_v8 = vld [vmem:[%s5015_s8 + $0x428] ss:$48 sps:$4 sm:$0xff]   ;;  %v4408_v11 = vld [vmem:[%s5015_s8 + $0x3c4] ss:$48 sps:$4 sm:$0xff]   ;;  %v4410_v12 = vld [vmem:[%s5015_s8 + $0x3cc] ss:$48 sps:$4 sm:$0xff]  }
  0x29   : > { %2862 = vmatpush1.bf16.xpose.msra.mxu0 %v4346_v27  ;;  %v4412_v13 = vld [vmem:[%s5015_s8 + $0x3c0] ss:$48 sps:$4 sm:$0xff]   ;;  %v4413_v14 = vld [vmem:[%s5015_s8 + $0x3c8] ss:$48 sps:$4 sm:$0xff]   ;;  %v4414_v15 = vld [vmem:[%s5015_s8 + $0x364] ss:$48 sps:$4 sm:$0xff]  }
  0x2a   : > { %2933 = vmatpush1.bf16.xpose.msra.mxu1 %v4347_v28  ;;  %2863 = vmatprep.subr.bf16.mxu0 %v4348_v29  ;;  %v4416_v16 = vld [vmem:[%s5015_s8 + $0x36c] ss:$48 sps:$4 sm:$0xff]   ;;  %v4418_v17 = vld [vmem:[%s5015_s8 + $0x360] ss:$48 sps:$4 sm:$0xff]   ;;  %v4419_v18 = vld [vmem:[%s5015_s8 + $0x368] ss:$48 sps:$4 sm:$0xff]  }
  0x2b   : > { %2934 = vmatprep.subr.bf16.mxu1 %v4350_v30  ;;  %v4420_v21 = vld [vmem:[%s5015_s8 + $0x304] ss:$48 sps:$4 sm:$0xff]   ;;  %v4422_v22 = vld [vmem:[%s5015_s8 + $0x30c] ss:$48 sps:$4 sm:$0xff]   ;;  %v6265_v23 = vsub.s32 0, %v4981_v1  ;;  %v6264_v24 = vsub.s32 2, %v4981_v1 }
  0x2c   : > { %v4424_v25 = vld [vmem:[%s5015_s8 + $0x300] ss:$48 sps:$4 sm:$0xff]   ;;  %v4425_v26 = vld [vmem:[%s5015_s8 + $0x308] ss:$48 sps:$4 sm:$0xff]  }
  0x2d   : > { %v196_v27 = vld [vmem:[%s6260_s0] sm:$0xff]  ;;  %v198_v29 = vld [vmem:[%s6260_s0 + $0x10] sm:$0xff] }
  0x2e   : > { %v208_v28 = vld [vmem:[%s6260_s0 + $0x60] sm:$0xff]  ;;  %v210_v30 = vld [vmem:[%s6260_s0 + $0x70] sm:$0xff] }
  0x31   : > { %2864 = vmatpush1.bf16.xpose.msra.mxu0 %v4352_v31  ;;  %v5108_v31 = vrot.slane %v4986_v2, %v6265_v23  ;;  %v4599_v23 = vld [vmem:[%s5015_s8 + $0x448] ss:$48 sps:$4 sm:$0xff]  }
  0x32   : > { %2935 = vmatpush1.bf16.xpose.msra.mxu1 %v4353_v32  ;;  %2865 = vmatprep.subr.bf16.mxu0 %v4354_v33  ;;  %v5113_v32 = vrot.slane %v4986_v2, %v6264_v24  ;;  %v4428_v33 = vld [vmem:[%s5015_s8 + $0x2b4] ss:$48 sps:$4 sm:$0xff]   ;;  %v4597_v24 = vld [vmem:[%s5015_s8 + $0x44c] ss:$48 sps:$4 sm:$0xff]  }
  0x33   : > { %2936 = vmatprep.subr.bf16.mxu1 %v4356_v34  ;;  %v4431_v34 = vld [vmem:[%s5015_s8 + $0x2bc] ss:$48 sps:$4 sm:$0xff]  }
  0x39   : > { %2866 = vmatpush1.bf16.xpose.msra.mxu0 %v4358_v35  ;;  %v221_v35 = vld [vmem:[%s6260_s0 + $0xc8] sm:$0xff] }
  0x3a   : > { %2937 = vmatpush1.bf16.xpose.msra.mxu1 %v4359_v36  ;;  %2867 = vmatprep.subr.bf16.mxu0 %v4360_v37  ;;  %v233_v36 = vld [vmem:[%s6260_s0 + $0x128] sm:$0xff]  ;;  %v223_v37 = vld [vmem:[%s6260_s0 + $0xd8] sm:$0xff] }
  0x3b   : > { %2938 = vmatprep.subr.bf16.mxu1 %v4362_v38  ;;  %v235_v38 = vld [vmem:[%s6260_s0 + $0x138] sm:$0xff] }
  0x41   : > { %2868 = vmatpush1.bf16.xpose.msra.mxu0 %v4364_v39  ;;  %v344_v39 = vmul.f32 %v5108_v31, %v196_v27 }
  0x42   : > { %2939 = vmatpush1.bf16.xpose.msra.mxu1 %v4365_v40  ;;  %2869 = vmatprep.subr.bf16.mxu0 %v4366_v41  ;;  %v356_v40 = vmul.f32 %v5108_v31, %v208_v28  ;;  %v346_v41 = vmul.f32 %v5113_v32, %v198_v29 }
  0x43   : > { %2940 = vmatprep.subr.bf16.mxu1 %v4368_v42  ;;  %v358_v42 = vmul.f32 %v5113_v32, %v210_v30  ;;  %v269_v30 = vld [vmem:[%s6260_s0 + $0x248] sm:$0x1] }
  0x49   : > { %2870 = vmatpush1.bf16.xpose.msra.mxu0 %v4370_v43  ;;  %v220_v43 = vld [vmem:[%s6260_s0 + $0xc0] sm:$0xff] }
  0x4a   : > { %2941 = vmatpush1.bf16.xpose.msra.mxu1 %v4371_v44  ;;  %2871 = vmatprep.subr.bf16.mxu0 %v4372_v45  ;;  %v4426_v44 = vld [vmem:[%s5015_s8 + $0x2b0] ss:$48 sps:$4 sm:$0xff]   ;;  %v4429_v45 = vld [vmem:[%s5015_s8 + $0x2b8] ss:$48 sps:$4 sm:$0xff]  }
  0x4b   : > { %2942 = vmatprep.subr.bf16.mxu1 %v4374_v46  ;;  %v369_v46 = vmul.f32 %v5005_v9, %v221_v35 }
  0x51   : > { %2872 = vmatpush1.bf16.xpose.msra.mxu0 %v4376_v47  ;;  %v381_v47 = vmul.f32 %v5005_v9, %v233_v36 }
  0x52   : > { %2943 = vmatpush1.bf16.xpose.msra.mxu1 %v4377_v48  ;;  %2873 = vmatprep.subr.bf16.mxu0 %v4378_v49  ;;  %v371_v48 = vmul.f32 %v5010_v10, %v223_v37  ;;  %v383_v49 = vmul.f32 %v5010_v10, %v235_v38  ;;  %v306_v37 = vsub.s32 5, %v4981_v1  ;;  %v4438_v38 = vld [vmem:[%s5015_s8 + $0x1f0] ss:$48 sps:$4 sm:$0xff]  }
  0x53   : > { %2944 = vmatprep.subr.bf16.mxu1 %v4380_v50  ;;  %v232_v50 = vld [vmem:[%s6260_s0 + $0x120] sm:$0xff] }
  0x59   : > { %2874 = vmatpush2.bf16.xpose.msra.mxu0 %v4382_v51  ;;  %v222_v51 = vld [vmem:[%s6260_s0 + $0xd0] sm:$0xff] }
  0x5a   : > { %2945 = vmatpush2.bf16.xpose.msra.mxu1 %v4383_v52  ;;  %2875 = vmatprep.subr.bf16.mxu0 %v4384_v53  ;;  %v234_v52 = vld [vmem:[%s6260_s0 + $0x130] sm:$0xff]  ;;  %v5151_v53 = vpack.c.bf16 %v356_v40, %v344_v39  ;;  %v4441_v39 = vld [vmem:[%s5015_s8 + $0x1f8] ss:$48 sps:$4 sm:$0xff]   ;;  %v417_v40 = vmul.f32 %v5005_v9, %v269_v30 }
  0x5b   : > { %2946 = vmatprep.subr.bf16.mxu1 %v4386_v54  ;;  %v5153_v54 = vpack.c.bf16 %v358_v42, %v346_v41  ;;  %v314_v42 = vsub.s32 7, %v4981_v1  ;;  %v4470_v30 = vld [vmem:[%s5015_s8 + $0x14] ss:$48 sps:$4 sm:$0xff]  }
  0x61   : > { %2876 = vmatpush2.bf16.xpose.msra.mxu0 %v4388_v55  ;;  %v4434_v55 = vld [vmem:[%s5015_s8 + $0x254] ss:$48 sps:$4 sm:$0xff]  }
  0x62   : > { %2947 = vmatpush2.bf16.xpose.msra.mxu1 %v4389_v56  ;;  %2877 = vmatprep.subr.bf16.mxu0 %v4390_v57  ;;  %v4437_v56 = vld [vmem:[%s5015_s8 + $0x25c] ss:$48 sps:$4 sm:$0xff]  }
  0x63   : > { %2948 = vmatprep.subr.bf16.mxu1 %v4392_v58  ;;  %v245_v57 = vld [vmem:[%s6260_s0 + $0x188] sm:$0xff] }
  0x64   : > { %v257_v58 = vld [vmem:[%s6260_s0 + $0x1e8] sm:$0xff] }
  0x69   : > { %2878 = vmatpush2.bf16.xpose.msra.mxu0 %v4394_v59  ;;  %v5163_v59 = vpack.c.bf16 %v381_v47, %v369_v46  ;;  %v268_v47 = vld [vmem:[%s6260_s0 + $0x240] sm:$0x1] }
  0x6a   : > { %2949 = vmatpush2.bf16.xpose.msra.mxu1 %v4395_v60  ;;  %2879 = vmatprep.subr.bf16.mxu0 %v4396_v61  ;;  %v5165_v60 = vpack.c.bf16 %v383_v49, %v371_v48  ;;  %v368_v61 = vmul.f32 %v5108_v31, %v220_v43  ;;  %v4446_v43 = vld [vmem:[%s5015_s8 + $0x194] ss:$48 sps:$4 sm:$0xff]   ;;  %v270_v48 = vld [vmem:[%s6260_s0 + $0x250] sm:$0x1]  ;;  %v5248_v49 = vrot.slane %v4986_v2, %v306_v37  ;;  %v4479_v37 = vld [vmem:[%s5015_s8 + $0x5bc] ss:$48 sps:$4 sm:$0xff]  }
  0x6b   : > { %2950 = vmatprep.subr.bf16.mxu1 %v4398_v62  ;;  %v247_v62 = vld [vmem:[%s6260_s0 + $0x198] sm:$0xff] }
  0x71   : > { %2880 = vmatpush2.bf16.xpose.msra.mxu0 %v4400_v63  ;;  %v259_v63 = vld [vmem:[%s6260_s0 + $0x1f8] sm:$0xff] }
  0x72   : > { %2951 = vmatpush2.bf16.xpose.msra.mxu1 %v4401_v0  ;;  %2881 = vmatprep.subr.bf16.mxu0 %v4402_v3  ;;  %v380_v0 = vmul.f32 %v5108_v31, %v232_v50  ;;  %v370_v3 = vmul.f32 %v5113_v32, %v222_v51  ;;  %v5250_v50 = vpack.c.bf16 %v417_v40, %v417_v40  ;;  %v4482_v40 = vld [vmem:[%s5015_s8 + $0x554] ss:$48 sps:$4 sm:$0xff]  }
  0x73   : > { %2952 = vmatprep.subr.bf16.mxu1 %v4404_v6  ;;  %v382_v6 = vmul.f32 %v5113_v32, %v234_v52  ;;  %v203_v52 = vld [vmem:[%s6260_s0 + $0x38] sm:$0xff] }
  0x79   : > { %2882 = vmatpush2.bf16.xpose.msra.mxu0 %v4406_v7  ;;  %v393_v7 = vmul.f32 %v5005_v9, %v245_v57  ;;  %v416_v57 = vmul.f32 %v5108_v31, %v268_v47  ;;  %v4491_v47 = vld [vmem:[%s5015_s8 + $0x4fc] ss:$48 sps:$4 sm:$0xff]  }
  0x7a   : > { %2953 = vmatpush2.bf16.xpose.msra.mxu1 %v4407_v8  ;;  %2883 = vmatprep.subr.bf16.mxu0 %v4408_v11  ;;  %v4432_v8 = vld [vmem:[%s5015_s8 + $0x250] ss:$48 sps:$4 sm:$0xff]   ;;  %v4435_v11 = vld [vmem:[%s5015_s8 + $0x258] ss:$48 sps:$4 sm:$0xff]  }
  0x7b   : > { %2954 = vmatprep.subr.bf16.mxu1 %v4410_v12  ;;  %v405_v12 = vmul.f32 %v5005_v9, %v257_v58  ;;  %v201_v9 = vld [vmem:[%s6260_s0 + $0x28] sm:$0xff]  ;;  %v418_v58 = vmul.f32 %v5113_v32, %v270_v48  ;;  %v4486_v48 = vld [vmem:[%s5015_s8 + $0x4f0] ss:$48 sps:$4 sm:$0xff]  }
  0x7d   : > { %v5205_v27 = vpack.c.bf16 %v405_v12, %v393_v7  ;;  %v4455_v7 = vld [vmem:[%s5015_s8 + $0x13c] ss:$48 sps:$4 sm:$0xff]   ;;  %v4450_v12 = vld [vmem:[%s5015_s8 + $0x130] ss:$48 sps:$4 sm:$0xff]  }
  0x81   : > { %2884 = vmatpush2.bf16.xpose.msra.mxu0 %v4412_v13  ;;  %v395_v13 = vmul.f32 %v5010_v10, %v247_v62 }
  0x82   : > { %2955 = vmatpush2.bf16.xpose.msra.mxu1 %v4413_v14  ;;  %2885 = vmatprep.subr.bf16.mxu0 %v4414_v15  ;;  %v407_v14 = vmul.f32 %v5010_v10, %v259_v63  ;;  %v5187_v15 = vpack.c.bf16 %v380_v0, %v368_v61  ;;  %v349_v61 = vmul.f32 %v5248_v49, %v201_v9  ;;  %v4489_v9 = vld [vmem:[%s5015_s8 + $0x4f8] ss:$48 sps:$4 sm:$0xff]  }
  0x83   : > { %2956 = vmatprep.subr.bf16.mxu1 %v4416_v16  ;;  %v5189_v16 = vpack.c.bf16 %v382_v6, %v370_v3  ;;  %v5274_v63 = vpack.c.bf16 %v416_v57, %v416_v57  ;;  %v5276_v0 = vpack.c.bf16 %v418_v58, %v418_v58  ;;  %v4447_v3 = vld [vmem:[%s5015_s8 + $0x198] ss:$48 sps:$4 sm:$0xff]   ;;  %v4452_v6 = vld [vmem:[%s5015_s8 + $0x134] ss:$48 sps:$4 sm:$0xff]  }
  0x84   : > { %v5207_v28 = vpack.c.bf16 %v407_v14, %v395_v13  ;;  %v4453_v13 = vld [vmem:[%s5015_s8 + $0x138] ss:$48 sps:$4 sm:$0xff]   ;;  %v4458_v14 = vld [vmem:[%s5015_s8 + $0xd4] ss:$48 sps:$4 sm:$0xff]  }
  0x85   : > { %v4495_v57 = vld [vmem:[%s5015_s8 + $0x498] ss:$48 sps:$4 sm:$0xff]   ;;  %v4500_v58 = vld [vmem:[%s5015_s8 + $0x434] ss:$48 sps:$4 sm:$0xff]  }
  0x89   : > { %2886 = vmatpush2.bf16.xpose.msra.mxu0 %v4418_v17  ;;  %v244_v17 = vld [vmem:[%s6260_s0 + $0x180] sm:$0xff] }
  0x8a   : > { %2957 = vmatpush2.bf16.xpose.msra.mxu1 %v4419_v18  ;;  %2887 = vmatprep.subr.bf16.mxu0 %v4420_v21  ;;  %v256_v18 = vld [vmem:[%s6260_s0 + $0x1e0] sm:$0xff]  ;;  %v246_v21 = vld [vmem:[%s6260_s0 + $0x190] sm:$0xff]  ;;  %v392_v29 = vmul.f32 %v5108_v31, %v244_v17  ;;  %v4461_v17 = vld [vmem:[%s5015_s8 + $0xdc] ss:$48 sps:$4 sm:$0xff]  }
  0x8b   : > { %2958 = vmatprep.subr.bf16.mxu1 %v4422_v22  ;;  %v258_v22 = vld [vmem:[%s6260_s0 + $0x1f0] sm:$0xff]  ;;  %v394_v35 = vmul.f32 %v5113_v32, %v246_v21  ;;  %v4459_v21 = vld [vmem:[%s5015_s8 + $0xd8] ss:$48 sps:$4 sm:$0xff]  }
  0x8c   : > { %v406_v36 = vmul.f32 %v5113_v32, %v258_v22  ;;  %v4444_v32 = vld [vmem:[%s5015_s8 + $0x190] ss:$48 sps:$4 sm:$0xff]   ;;  %v4464_v22 = vld [vmem:[%s5015_s8 + $0x74] ss:$48 sps:$4 sm:$0xff]  }
  0x8e   : > { %v5233_v46 = vpack.c.bf16 %v406_v36, %v394_v35  ;;  %v4471_v35 = vld [vmem:[%s5015_s8 + $0x18] ss:$48 sps:$4 sm:$0xff]   ;;  %v4476_v36 = vld [vmem:[%s5015_s8 + $0x5b4] ss:$48 sps:$4 sm:$0xff]  }
  0x91   : > { %2888 = vmatpush2.bf16.xpose.msra.mxu0 %v4424_v25  ;;  %v4440_v25 = vld [vmem:[%s5015_s8 + $0x1f4] ss:$48 sps:$4 sm:$0xff]  }
  0x92   : > { %2959 = vmatpush2.bf16.xpose.msra.mxu1 %v4425_v26  ;;  %2999 = vmatprep.subr.bf16.mxu0 %v4428_v33  ;;  %v4443_v26 = vld [vmem:[%s5015_s8 + $0x1fc] ss:$48 sps:$4 sm:$0xff]   ;;  %v271_v33 = vld [vmem:[%s6260_s0 + $0x258] sm:$0x1] }
  0x93   : > { %3070 = vmatprep.subr.bf16.mxu1 %v4431_v34  ;;  %v404_v34 = vmul.f32 %v5108_v31, %v256_v18  ;;  %v419_v41 = vmul.f32 %v5010_v10, %v271_v33  ;;  %v213_v10 = vld [vmem:[%s6260_s0 + $0x88] sm:$0xff]  ;;  %v4456_v18 = vld [vmem:[%s5015_s8 + $0xd0] ss:$48 sps:$4 sm:$0xff]  }
  0x94   : > { %v4473_v33 = vld [vmem:[%s5015_s8 + $0x1c] ss:$48 sps:$4 sm:$0xff]  }
  0x95   : > { %v5252_v51 = vpack.c.bf16 %v419_v41, %v419_v41  ;;  %v4485_v41 = vld [vmem:[%s5015_s8 + $0x55c] ss:$48 sps:$4 sm:$0xff]  }
  0x98   : > { %2890 = vmatmul.mubr.bf16.vlgmr.msra.gmra.mxu0 %v5151_v53 }
  0x99   : > { %2961 = vmatmul.mubr.bf16.vlgmr.msra.gmra.mxu1 %v5153_v54  ;;  %3000 = vmatpush1.bf16.xpose.msra.mxu0 %v4426_v44  ;;  %v4449_v44 = vld [vmem:[%s5015_s8 + $0x19c] ss:$48 sps:$4 sm:$0xff]  }
  0x9a   : > { %3071 = vmatpush1.bf16.xpose.msra.mxu1 %v4429_v45  ;;  %3001 = vmatprep.subr.bf16.mxu0 %v4434_v55  ;;  %v5231_v45 = vpack.c.bf16 %v404_v34, %v392_v29  ;;  %v215_v55 = vld [vmem:[%s6260_s0 + $0x98] sm:$0xff]  ;;  %v4468_v34 = vld [vmem:[%s5015_s8 + $0x10] ss:$48 sps:$4 sm:$0xff]  }
  0x9b   : > { %3072 = vmatprep.subr.bf16.mxu1 %v4437_v56  ;;  %2899 = vmatprep.mubr.bf16.mxu0 %v5163_v59  ;;  %v5261_v56 = vrot.slane %v4986_v2, %v314_v42  ;;  %v361_v2 = vmul.f32 %v5248_v49, %v213_v10  ;;  %v4465_v29 = vld [vmem:[%s5015_s8 + $0x78] ss:$48 sps:$4 sm:$0xff]   ;;  %v4480_v42 = vld [vmem:[%s5015_s8 + $0x550] ss:$48 sps:$4 sm:$0xff]   ;;  %v4494_v10 = vld [vmem:[%s5015_s8 + $0x494] ss:$48 sps:$4 sm:$0xff]  }
  0x9c   : > { %2970 = vmatprep.mubr.bf16.mxu1 %v5165_v60 }
  0x9d   : > { %v351_v62 = vmul.f32 %v5261_v56, %v203_v52  ;;  %v363_v31 = vmul.f32 %v5261_v56, %v215_v55  ;;  %v4497_v52 = vld [vmem:[%s5015_s8 + $0x49c] ss:$48 sps:$4 sm:$0xff]   ;;  %v4492_v55 = vld [vmem:[%s5015_s8 + $0x490] ss:$48 sps:$4 sm:$0xff]  }
  0xa0   : > { %2900 = vmatmul.mubr.bf16.gmra.mxu0 %v5187_v15 }
  0xa1   : > { %2971 = vmatmul.mubr.bf16.gmra.mxu1 %v5189_v16  ;;  %3002 = vmatpush1.bf16.xpose.msra.mxu0 %v4432_v8  ;;  %v5281_v8 = vpack.c.bf16 %v361_v2, %v349_v61  ;;  %v4503_v61 = vld [vmem:[%s5015_s8 + $0x43c] ss:$48 sps:$4 sm:$0xff]   ;;  %v4498_v2 = vld [vmem:[%s5015_s8 + $0x430] ss:$48 sps:$4 sm:$0xff]  }
  0xa2   : > { %3073 = vmatpush1.bf16.xpose.msra.mxu1 %v4435_v11  ;;  %3003 = vmatprep.subr.bf16.mxu0 %v4440_v25  ;;  %v5283_v11 = vpack.c.bf16 %v363_v31, %v351_v62  ;;  %v4467_v25 = vld [vmem:[%s5015_s8 + $0x7c] ss:$48 sps:$4 sm:$0xff]   ;;  %v4501_v62 = vld [vmem:[%s5015_s8 + $0x438] ss:$48 sps:$4 sm:$0xff]   ;;  %v4506_v31 = vld [vmem:[%s5015_s8 + $0x3d4] ss:$48 sps:$4 sm:$0xff]  }
  0xa3   : > { %3074 = vmatprep.subr.bf16.mxu1 %v4443_v26  ;;  %2909 = vmatprep.mubr.bf16.mxu0 %v5205_v27  ;;  %v4462_v26 = vld [vmem:[%s5015_s8 + $0x70] ss:$48 sps:$4 sm:$0xff]  }
  0xa4   : > { %2980 = vmatprep.mubr.bf16.mxu1 %v5207_v28 }
  0xa8   : > { %2910 = vmatmul.mubr.bf16.gmra.mxu0 %v5231_v45 }
  0xa9   : > { %2981 = vmatmul.mubr.bf16.gmra.mxu1 %v5233_v46  ;;  %3004 = vmatpush1.bf16.xpose.msra.mxu0 %v4438_v38  ;;  %v4474_v38 = vld [vmem:[%s5015_s8 + $0x5b0] ss:$48 sps:$4 sm:$0xff]  }
  0xaa   : > { %3075 = vmatpush1.bf16.xpose.msra.mxu1 %v4441_v39  ;;  %3005 = vmatprep.subr.bf16.mxu0 %v4446_v43  ;;  %v4477_v39 = vld [vmem:[%s5015_s8 + $0x5b8] ss:$48 sps:$4 sm:$0xff]  }
  0xab   : > { %3076 = vmatprep.subr.bf16.mxu1 %v4449_v44  ;;  %2919 = vmatprep.mubr.bf16.mxu0 %v5250_v50  ;;  %v4483_v43 = vld [vmem:[%s5015_s8 + $0x558] ss:$48 sps:$4 sm:$0xff]   ;;  %v4488_v44 = vld [vmem:[%s5015_s8 + $0x4f4] ss:$48 sps:$4 sm:$0xff]  }
  0xac   : > { %2990 = vmatprep.mubr.bf16.mxu1 %v5252_v51 }
  0xb0   : > { %2920 = vmatmul.mubr.bf16.gmra.mxu0 %v5274_v63 }
  0xb1   : > { %2991 = vmatmul.mubr.bf16.gmra.mxu1 %v5276_v0  ;;  %3006 = vmatpush1.bf16.xpose.msra.mxu0 %v4444_v32  ;;  %v4509_v32 = vld [vmem:[%s5015_s8 + $0x3dc] ss:$48 sps:$4 sm:$0xff]  }
  0xb2   : > { %3077 = vmatpush1.bf16.xpose.msra.mxu1 %v4447_v3  ;;  %3007 = vmatprep.subr.bf16.mxu0 %v4452_v6  ;;  %v4504_v3 = vld [vmem:[%s5015_s8 + $0x3d0] ss:$48 sps:$4 sm:$0xff]   ;;  %v4507_v6 = vld [vmem:[%s5015_s8 + $0x3d8] ss:$48 sps:$4 sm:$0xff]  }
  0xb3   : > { %3078 = vmatprep.subr.bf16.mxu1 %v4455_v7  ;;  %3031 = vmatprep.mubr.bf16.mxu0 %v5281_v8  ;;  %v4512_v7 = vld [vmem:[%s5015_s8 + $0x374] ss:$48 sps:$4 sm:$0xff]  }
  0xb4   : > { %3102 = vmatprep.mubr.bf16.mxu1 %v5283_v11 }
  0xb9   : > { %3008 = vmatpush1.bf16.xpose.msra.mxu0 %v4450_v12  ;;  %v4515_v12 = vld [vmem:[%s5015_s8 + $0x37c] ss:$48 sps:$4 sm:$0xff]  }
  0xba   : > { %3079 = vmatpush1.bf16.xpose.msra.mxu1 %v4453_v13  ;;  %3009 = vmatprep.subr.bf16.mxu0 %v4458_v14  ;;  %v4510_v13 = vld [vmem:[%s5015_s8 + $0x370] ss:$48 sps:$4 sm:$0xff]   ;;  %v4513_v14 = vld [vmem:[%s5015_s8 + $0x378] ss:$48 sps:$4 sm:$0xff]  }
  0xbb   : > { %3080 = vmatprep.subr.bf16.mxu1 %v4461_v17  ;;  %v4518_v17 = vld [vmem:[%s5015_s8 + $0x314] ss:$48 sps:$4 sm:$0xff]  }
  0xc1   : > { %3010 = vmatpush1.bf16.xpose.msra.mxu0 %v4456_v18  ;;  %v4521_v18 = vld [vmem:[%s5015_s8 + $0x31c] ss:$48 sps:$4 sm:$0xff]  }
  0xc2   : > { %3081 = vmatpush1.bf16.xpose.msra.mxu1 %v4459_v21  ;;  %3011 = vmatprep.subr.bf16.mxu0 %v4464_v22  ;;  %v302_v21 = vsub.s32 4, %v4981_v1  ;;  %v310_v22 = vsub.s32 6, %v4981_v1 }
  0xc3   : > { %3082 = vmatprep.subr.bf16.mxu1 %v4467_v25  ;;  %v4516_v25 = vld [vmem:[%s5015_s8 + $0x310] ss:$48 sps:$4 sm:$0xff]  }
  0xc9   : > { %3012 = vmatpush1.bf16.xpose.msra.mxu0 %v4462_v26  ;;  %v4519_v26 = vld [vmem:[%s5015_s8 + $0x318] ss:$48 sps:$4 sm:$0xff]  }
  0xca   : > { %3083 = vmatpush1.bf16.xpose.msra.mxu1 %v4465_v29  ;;  %3013 = vmatprep.subr.bf16.mxu0 %v4470_v30  ;;  %v200_v29 = vld [vmem:[%s6260_s0 + $0x20] sm:$0xff] }
  0xcb   : > { %3084 = vmatprep.subr.bf16.mxu1 %v4473_v33  ;;  %v4906_v30 = vld [vmem:[%s6261_s1] sm:$0xff] }
  0xcc   : > { %v5343_v33 = vrot.slane %v4906_v30, %v302_v21  ;;  %v261_v21 = vld [vmem:[%s6260_s0 + $0x208] sm:$0xff] }
  0xd1   : > { %3014 = vmatpush1.bf16.xpose.msra.mxu0 %v4468_v34  ;;  %v5345_v34 = vrot.slane %v4906_v30, %v310_v22  ;;  %v263_v30 = vld [vmem:[%s6260_s0 + $0x218] sm:$0xff] }
  0xd2   : > { %3085 = vmatpush1.bf16.xpose.msra.mxu1 %v4471_v35  ;;  %3015 = vmatprep.subr.bf16.mxu0 %v4476_v36  ;;  %v212_v35 = vld [vmem:[%s6260_s0 + $0x80] sm:$0xff]  ;;  %v202_v36 = vld [vmem:[%s6260_s0 + $0x30] sm:$0xff] }
  0xd3   : > { %3086 = vmatprep.subr.bf16.mxu1 %v4479_v37  ;;  %v214_v37 = vld [vmem:[%s6260_s0 + $0x90] sm:$0xff] }
  0xd9   : > { %3016 = vmatpush2.bf16.xpose.msra.mxu0 %v4474_v38  ;;  %v4524_v38 = vld [vmem:[%s5015_s8 + $0x2c4] ss:$48 sps:$4 sm:$0xff]  }
  0xda   : > { %3087 = vmatpush2.bf16.xpose.msra.mxu1 %v4477_v39  ;;  %3017 = vmatprep.subr.bf16.mxu0 %v4482_v40  ;;  %v4525_v39 = vld [vmem:[%s5015_s8 + $0x2cc] ss:$48 sps:$4 sm:$0xff]  }
  0xdb   : > { %3088 = vmatprep.subr.bf16.mxu1 %v4485_v41  ;;  %v225_v40 = vld [vmem:[%s6260_s0 + $0xe8] sm:$0xff] }
  0xdc   : > { %v237_v41 = vld [vmem:[%s6260_s0 + $0x148] sm:$0xff] }
  0xe1   : > { %3018 = vmatpush2.bf16.xpose.msra.mxu0 %v4480_v42  ;;  %v348_v42 = vmul.f32 %v5343_v33, %v200_v29  ;;  %v251_v29 = vld [vmem:[%s6260_s0 + $0x1b8] sm:$0xff] }
  0xe2   : > { %3089 = vmatpush2.bf16.xpose.msra.mxu1 %v4483_v43  ;;  %3019 = vmatprep.subr.bf16.mxu0 %v4488_v44  ;;  %v360_v43 = vmul.f32 %v5343_v33, %v212_v35  ;;  %v350_v44 = vmul.f32 %v5345_v34, %v202_v36  ;;  %v409_v36 = vmul.f32 %v5248_v49, %v261_v21 }
  0xe3   : > { %3090 = vmatprep.subr.bf16.mxu1 %v4491_v47  ;;  %v362_v47 = vmul.f32 %v5345_v34, %v214_v37  ;;  %v399_v37 = vmul.f32 %v5261_v56, %v251_v29  ;;  %v4542_v29 = vld [vmem:[%s5015_s8 + $0x1a4] ss:$48 sps:$4 sm:$0xff]  }
  0xe9   : > { %3020 = vmatpush2.bf16.xpose.msra.mxu0 %v4486_v48  ;;  %v227_v48 = vld [vmem:[%s6260_s0 + $0xf8] sm:$0xff] }
  0xea   : > { %3091 = vmatpush2.bf16.xpose.msra.mxu1 %v4489_v9  ;;  %3021 = vmatprep.subr.bf16.mxu0 %v4494_v10  ;;  %v239_v9 = vld [vmem:[%s6260_s0 + $0x158] sm:$0xff]  ;;  %v373_v10 = vmul.f32 %v5248_v49, %v225_v40  ;;  %v4528_v40 = vld [vmem:[%s5015_s8 + $0x260] ss:$48 sps:$4 sm:$0xff]  }
  0xeb   : > { %3092 = vmatprep.subr.bf16.mxu1 %v4497_v52  ;;  %v385_v52 = vmul.f32 %v5248_v49, %v237_v41  ;;  %v4533_v41 = vld [vmem:[%s5015_s8 + $0x268] ss:$48 sps:$4 sm:$0xff]  }
  0xf1   : > { %3022 = vmatpush2.bf16.xpose.msra.mxu0 %v4492_v55  ;;  %v375_v55 = vmul.f32 %v5261_v56, %v227_v48  ;;  %v262_v48 = vld [vmem:[%s6260_s0 + $0x210] sm:$0xff] }
  0xf2   : > { %3093 = vmatpush2.bf16.xpose.msra.mxu1 %v4495_v57  ;;  %3023 = vmatprep.subr.bf16.mxu0 %v4500_v58  ;;  %v387_v57 = vmul.f32 %v5261_v56, %v239_v9  ;;  %v5379_v58 = vpack.c.bf16 %v360_v43, %v348_v42  ;;  %v248_v43 = vld [vmem:[%s6260_s0 + $0x1a0] sm:$0xff] }
  0xf3   : > { %3094 = vmatprep.subr.bf16.mxu1 %v4503_v61  ;;  %v5381_v61 = vpack.c.bf16 %v362_v47, %v350_v44  ;;  %v260_v44 = vld [vmem:[%s6260_s0 + $0x200] sm:$0xff]  ;;  %v250_v47 = vld [vmem:[%s6260_s0 + $0x1b0] sm:$0xff] }
  0xf9   : > { %3024 = vmatpush2.bf16.xpose.msra.mxu0 %v4498_v2  ;;  %v4522_v2 = vld [vmem:[%s5015_s8 + $0x2c0] ss:$48 sps:$4 sm:$0xff]  }
  0xfa   : > { %3095 = vmatpush2.bf16.xpose.msra.mxu1 %v4501_v62  ;;  %3025 = vmatprep.subr.bf16.mxu0 %v4506_v31  ;;  %v4527_v62 = vld [vmem:[%s5015_s8 + $0x2c8] ss:$48 sps:$4 sm:$0xff]   ;;  %v224_v31 = vld [vmem:[%s6260_s0 + $0xe0] sm:$0xff] }
  0xfb   : > { %3096 = vmatprep.subr.bf16.mxu1 %v4509_v32  ;;  %v236_v32 = vld [vmem:[%s6260_s0 + $0x140] sm:$0xff] }
  0xfc   : > { %v384_v22 = vmul.f32 %v5343_v33, %v236_v32  ;;  %v410_v32 = vmul.f32 %v5345_v34, %v262_v48 }
 0x101   : > { %3026 = vmatpush2.bf16.xpose.msra.mxu0 %v4504_v3  ;;  %v226_v3 = vld [vmem:[%s6260_s0 + $0xf0] sm:$0xff] }
 0x102   : > { %3097 = vmatpush2.bf16.xpose.msra.mxu1 %v4507_v6  ;;  %3027 = vmatprep.subr.bf16.mxu0 %v4512_v7  ;;  %v238_v6 = vld [vmem:[%s6260_s0 + $0x150] sm:$0xff]  ;;  %v5397_v7 = vpack.c.bf16 %v385_v52, %v373_v10  ;;  %v396_v52 = vmul.f32 %v5343_v33, %v248_v43 }
 0x103   : > { %3098 = vmatprep.subr.bf16.mxu1 %v4515_v12  ;;  %v4530_v12 = vld [vmem:[%s5015_s8 + $0x264] ss:$48 sps:$4 sm:$0xff]  }
 0x104   : > { %v4536_v10 = vld [vmem:[%s5015_s8 + $0x204] ss:$48 sps:$4 sm:$0xff]  }
 0x109   : > { %3028 = vmatpush2.bf16.xpose.msra.mxu0 %v4510_v13  ;;  %v372_v13 = vmul.f32 %v5343_v33, %v224_v31  ;;  %v398_v31 = vmul.f32 %v5345_v34, %v250_v47 }
 0x10a   : > { %3099 = vmatpush2.bf16.xpose.msra.mxu1 %v4513_v14  ;;  %3029 = vmatprep.subr.bf16.mxu0 %v4518_v17  ;;  %v4531_v14 = vld [vmem:[%s5015_s8 + $0x26c] ss:$48 sps:$4 sm:$0xff]   ;;  %v5402_v17 = vpack.c.bf16 %v387_v57, %v375_v55 }
 0x10b   : > { %3100 = vmatprep.subr.bf16.mxu1 %v4521_v18  ;;  %v249_v18 = vld [vmem:[%s6260_s0 + $0x1a8] sm:$0xff]  ;;  %v5477_v21 = vpack.c.bf16 %v410_v32, %v398_v31  ;;  %v4546_v32 = vld [vmem:[%s5015_s8 + $0x140] ss:$48 sps:$4 sm:$0xff]  }
 0x10c   : > { %v397_v35 = vmul.f32 %v5248_v49, %v249_v18  ;;  %v4537_v55 = vld [vmem:[%s5015_s8 + $0x20c] ss:$48 sps:$4 sm:$0xff]   ;;  %v4534_v18 = vld [vmem:[%s5015_s8 + $0x200] ss:$48 sps:$4 sm:$0xff]  }
 0x10d   : > { %6282 = vst [vmem:[#allocation4_spill] sm:$0xff] %v5477_v21 }
 0x10e   : > { %v5446_v9 = vpack.c.bf16 %v409_v36, %v397_v35 }
 0x111   : > { %3030 = vmatpush2.bf16.xpose.msra.mxu0 %v4516_v25  ;;  %v374_v25 = vmul.f32 %v5345_v34, %v226_v3  ;;  %v275_v3 = vld [vmem:[%s6260_s0 + $0x278] sm:$0x1] }
 0x112   : > { %3101 = vmatpush2.bf16.xpose.msra.mxu1 %v4519_v26  ;;  %3141 = vmatprep.subr.bf16.mxu0 %v4524_v38  ;;  %v386_v26 = vmul.f32 %v5345_v34, %v238_v6  ;;  %v411_v38 = vmul.f32 %v5261_v56, %v263_v30  ;;  %v4543_v30 = vld [vmem:[%s5015_s8 + $0x1ac] ss:$48 sps:$4 sm:$0xff]  }
 0x113   : > { %4259 = vmatprep.subr.msk.bf16.mxu1 %vm2748_vm0, %v4525_v39  ;;  %v5428_v39 = vpack.c.bf16 %v384_v22, %v372_v13  ;;  %v423_v13 = vmul.f32 %v5261_v56, %v275_v3  ;;  %v4539_v22 = vld [vmem:[%s5015_s8 + $0x208] ss:$48 sps:$4 sm:$0xff]  }
 0x114   : > { %v5432_v42 = vpack.c.bf16 %v386_v26, %v374_v25  ;;  %v5451_v57 = vpack.c.bf16 %v411_v38, %v399_v37  ;;  %v274_v25 = vld [vmem:[%s6260_s0 + $0x270] sm:$0x1]  ;;  %v207_v37 = vld [vmem:[%s6260_s0 + $0x58] sm:$0xff] }
 0x115   : > { %v5495_v35 = vpack.c.bf16 %v423_v13, %v423_v13  ;;  %v422_v38 = vmul.f32 %v5345_v34, %v274_v25  ;;  %v4551_v3 = vld [vmem:[%s5015_s8 + $0x148] ss:$48 sps:$4 sm:$0xff]   ;;  %v4555_v13 = vld [vmem:[%s5015_s8 + $0xec] ss:$48 sps:$4 sm:$0xff]  }
 0x116   : > { %v4561_v25 = vld [vmem:[%s5015_s8 + $0x8c] ss:$48 sps:$4 sm:$0xff]  }
 0x117   : > { %6284 = vst [vmem:[#allocation6_spill] sm:$0xff] %v5495_v35  ;;  %v5527_v48 = vpack.c.bf16 %v422_v38, %v422_v38  ;;  %v4564_v38 = vld [vmem:[%s5015_s8 + $0x20] ss:$48 sps:$4 sm:$0xff]  }
 0x118   : > { %3032 = vmatmul.mubr.bf16.vlgmr.msra.gmra.mxu0 %v5379_v58 }
 0x119   : > { %3103 = vmatmul.mubr.bf16.vlgmr.msra.gmra.mxu1 %v5381_v61  ;;  %3142 = vmatpush1.bf16.xpose.msra.mxu0 %v4522_v2  ;;  %v273_v2 = vld [vmem:[%s6260_s0 + $0x268] sm:$0x1]  ;;  %6286 = vst [vmem:[#allocation8_spill] sm:$0xff] %v5527_v48 }
 0x11a   : > { %3213 = vmatpush1.bf16.xpose.msra.mxu1 %v4527_v62  ;;  %3041 = vmatprep.mubr.bf16.mxu0 %v5397_v7  ;;  %v408_v62 = vmul.f32 %v5343_v33, %v260_v44  ;;  %v421_v6 = vmul.f32 %v5248_v49, %v273_v2  ;;  %v272_v49 = vld [vmem:[%s6260_s0 + $0x260] sm:$0x1]  ;;  %v4549_v2 = vld [vmem:[%s5015_s8 + $0x14c] ss:$48 sps:$4 sm:$0xff]  }
 0x11b   : > { %3143 = vmatprep.subr.bf16.mxu0 %v4530_v12  ;;  %4260 = vmatprep.subr.msk.bf16.mxu1 %vm2748_vm0, %v4531_v14  ;;  %v5469_v12 = vld [vmem:[%s6261_s1 + $0x8] sm:$0xf] }
 0x11c   : > { %3112 = vmatprep.mubr.bf16.mxu1 %v5402_v17  ;;  %v5474_v14 = vpack.c.bf16 %v408_v62, %v396_v52  ;;  %v5489_v26 = vrot.slane %v5469_v12, %v298_v5  ;;  %v5491_v56 = vpack.c.bf16 %v421_v6, %v421_v6  ;;  %v5500_v36 = vrot.slane %v5469_v12, %v290_v4  ;;  %v217_v4 = vld [vmem:[%s6260_s0 + $0xa8] sm:$0xff]  ;;  %v4554_v6 = vld [vmem:[%s5015_s8 + $0xe4] ss:$48 sps:$4 sm:$0xff]  }
 0x11d   : > { %v420_v5 = vmul.f32 %v5343_v33, %v272_v49  ;;  %v4545_v52 = vld [vmem:[%s5015_s8 + $0x1a8] ss:$48 sps:$4 sm:$0xff]   ;;  %v4560_v49 = vld [vmem:[%s5015_s8 + $0x84] ss:$48 sps:$4 sm:$0xff]  }
 0x11e   : > { %6281 = vst [vmem:[#allocation3_spill] sm:$0xff] %v5474_v14  ;;  %6283 = vst [vmem:[#allocation5_spill] sm:$0xff] %v5491_v56  ;;  %v355_v33 = vmul.f32 %v5489_v26, %v207_v37  ;;  %v365_v43 = vmul.f32 %v5500_v36, %v217_v4  ;;  %v4566_v37 = vld [vmem:[%s5015_s8 + $0x24] ss:$48 sps:$4 sm:$0xff]  }
 0x11f   : > { %v5525_v47 = vpack.c.bf16 %v420_v5, %v420_v5  ;;  %v4567_v5 = vld [vmem:[%s5015_s8 + $0x2c] ss:$48 sps:$4 sm:$0xff]   ;;  %v4572_v4 = vld [vmem:[%s5015_s8 + $0x5c4] ss:$48 sps:$4 sm:$0xff]  }
 0x120   : > { %3042 = vmatmul.mubr.bf16.gmra.mxu0 %v5428_v39 }
 0x121   : > { %3113 = vmatmul.mubr.bf16.gmra.mxu1 %v5432_v42  ;;  %3144 = vmatpush1.bf16.xpose.msra.mxu0 %v4528_v40  ;;  %v205_v40 = vld [vmem:[%s6260_s0 + $0x48] sm:$0xff]  ;;  %6285 = vst [vmem:[#allocation7_spill] sm:$0xff] %v5525_v47 }
 0x122   : > { %3215 = vmatpush1.bf16.xpose.msra.mxu1 %v4533_v41  ;;  %3051 = vmatprep.mubr.bf16.mxu0 %v5446_v9  ;;  %v219_v41 = vld [vmem:[%s6260_s0 + $0xb8] sm:$0xff]  ;;  %v353_v34 = vmul.f32 %v5500_v36, %v205_v40 }
 0x123   : > { %3145 = vmatprep.subr.bf16.mxu0 %v4536_v10  ;;  %4261 = vmatprep.subr.msk.bf16.mxu1 %vm2748_vm0, %v4537_v55  ;;  %v367_v44 = vmul.f32 %v5489_v26, %v219_v41  ;;  %v4540_v10 = vld [vmem:[%s5015_s8 + $0x1a0] ss:$48 sps:$4 sm:$0xff]   ;;  %v4548_v55 = vld [vmem:[%s5015_s8 + $0x144] ss:$48 sps:$4 sm:$0xff]   ;;  %v4569_v40 = vld [vmem:[%s5015_s8 + $0x28] ss:$48 sps:$4 sm:$0xff]  }
 0x124   : > { %3122 = vmatprep.mubr.bf16.mxu1 %v5451_v57  ;;  %v5533_v62 = vpack.c.bf16 %v365_v43, %v353_v34  ;;  %v4573_v41 = vld [vmem:[%s5015_s8 + $0x5cc] ss:$48 sps:$4 sm:$0xff]   ;;  %v4575_v34 = vld [vmem:[%s5015_s8 + $0x5c8] ss:$48 sps:$4 sm:$0xff]   ;;  %v4578_v43 = vld [vmem:[%s5015_s8 + $0x564] ss:$48 sps:$4 sm:$0xff]  }
 0x125   : > { %v5535_v31 = vpack.c.bf16 %v367_v44, %v355_v33  ;;  %v4570_v33 = vld [vmem:[%s5015_s8 + $0x5c0] ss:$48 sps:$4 sm:$0xff]   ;;  %v4579_v44 = vld [vmem:[%s5015_s8 + $0x56c] ss:$48 sps:$4 sm:$0xff]  }
 0x126   : > { %6287 = vst [vmem:[#allocation9_spill] sm:$0xff] %v5533_v62 }
 0x127   : > { %6288 = vst [vmem:[#allocation10_spill] sm:$0xff] %v5535_v31 }
 0x128   : > { %3052 = vmatmul.mubr.bf16.gmra.mxu0 %v5474_v14  ;;  %v4621_v14 = vld [vmem:[%s5015_s8 + $0x8a8] ss:$48 sps:$4 sm:$0xff]  }
 0x129   : > { %3123 = vmatmul.mubr.bf16.gmra.mxu1 %v5477_v21  ;;  %3146 = vmatpush1.bf16.xpose.msra.mxu0 %v4534_v18  ;;  %v4552_v18 = vld [vmem:[%s5015_s8 + $0xe0] ss:$48 sps:$4 sm:$0xff]  }
 0x12a   : > { %3217 = vmatpush1.bf16.xpose.msra.mxu1 %v4539_v22  ;;  %3061 = vmatprep.mubr.bf16.mxu0 %v5491_v56  ;;  %v4557_v22 = vld [vmem:[%s5015_s8 + $0xe8] ss:$48 sps:$4 sm:$0xff]   ;;  %v4618_v21 = vld [vmem:[%s5015_s8 + $0x8a0] ss:$48 sps:$4 sm:$0xff]  }
 0x12b   : > { %3147 = vmatprep.subr.bf16.mxu0 %v4542_v29  ;;  %4262 = vmatprep.subr.msk.bf16.mxu1 %vm2748_vm0, %v4543_v30  ;;  %v4558_v29 = vld [vmem:[%s5015_s8 + $0x80] ss:$48 sps:$4 sm:$0xff]   ;;  %v4563_v30 = vld [vmem:[%s5015_s8 + $0x88] ss:$48 sps:$4 sm:$0xff]  }
 0x12c   : > { %3132 = vmatprep.mubr.bf16.mxu1 %v5495_v35 }
 0x130   : > { %3062 = vmatmul.mubr.bf16.gmra.mxu0 %v5525_v47  ;;  %v243_v47 = vld [vmem:[%s6260_s0 + $0x178] sm:$0xff] }
 0x131   : > { %3133 = vmatmul.mubr.bf16.gmra.mxu1 %v5527_v48  ;;  %3148 = vmatpush1.bf16.xpose.msra.mxu0 %v4540_v10  ;;  %v231_v48 = vld [vmem:[%s6260_s0 + $0x118] sm:$0xff] }
 0x132   : > { %3219 = vmatpush1.bf16.xpose.msra.mxu1 %v4545_v52  ;;  %3149 = vmatprep.subr.bf16.mxu0 %v4548_v55 }
 0x133   : > { %4263 = vmatprep.subr.msk.bf16.mxu1 %vm2748_vm0, %v4549_v2  ;;  %3173 = vmatprep.mubr.bf16.mxu0 %v5533_v62 }
 0x134   : > { %4275 = vmatprep.mubr.msk.bf16.mxu1 %vm2748_vm0, %v5535_v31  ;;  %v4602_v31 = vld [vmem:[%s5015_s8 + $0x3e4] ss:$48 sps:$4 sm:$0xff]  }
 0x139   : > { %3150 = vmatpush1.bf16.xpose.msra.mxu0 %v4546_v32 }
 0x13a   : > { %3221 = vmatpush1.bf16.xpose.msra.mxu1 %v4551_v3  ;;  %3151 = vmatprep.subr.bf16.mxu0 %v4554_v6 }
 0x13b   : > { %4264 = vmatprep.subr.msk.bf16.mxu1 %vm2748_vm0, %v4555_v13 }
 0x141   : > { %3152 = vmatpush1.bf16.xpose.msra.mxu0 %v4552_v18 }
 0x142   : > { %3223 = vmatpush1.bf16.xpose.msra.mxu1 %v4557_v22  ;;  %3153 = vmatprep.subr.bf16.mxu0 %v4560_v49  ;;  %v4576_v22 = vld [vmem:[%s5015_s8 + $0x560] ss:$48 sps:$4 sm:$0xff]   ;;  %v4581_v49 = vld [vmem:[%s5015_s8 + $0x568] ss:$48 sps:$4 sm:$0xff]  }
 0x143   : > { %4265 = vmatprep.subr.msk.bf16.mxu1 %vm2748_vm0, %v4561_v25 }
 0x149   : > { %3154 = vmatpush1.bf16.xpose.msra.mxu0 %v4558_v29 }
 0x14a   : > { %3225 = vmatpush1.bf16.xpose.msra.mxu1 %v4563_v30  ;;  %3155 = vmatprep.subr.bf16.mxu0 %v4566_v37  ;;  %v4584_v30 = vld [vmem:[%s5015_s8 + $0x504] ss:$48 sps:$4 sm:$0xff]   ;;  %v4585_v37 = vld [vmem:[%s5015_s8 + $0x50c] ss:$48 sps:$4 sm:$0xff]  }
 0x14b   : > { %4266 = vmatprep.subr.msk.bf16.mxu1 %vm2748_vm0, %v4567_v5 }
 0x151   : > { %3156 = vmatpush1.bf16.xpose.msra.mxu0 %v4564_v38 }
 0x152   : > { %3227 = vmatpush1.bf16.xpose.msra.mxu1 %v4569_v40  ;;  %3157 = vmatprep.subr.bf16.mxu0 %v4572_v4 }
 0x153   : > { %4267 = vmatprep.subr.msk.bf16.mxu1 %vm2748_vm0, %v4573_v41 }
 0x158   : > { %v2891_v10 = vpop.f32.mrf.mxu0 }
 0x159   : > { %v2962_v52 = vpop.f32.mrf.mxu1  ;;  %3158 = vmatpush2.bf16.xpose.msra.mxu0 %v4570_v33 }
 0x15a   : > { %v5567_v55 = vadd.f32 %v2962_v52, %v2891_v10  ;;  %3229 = vmatpush2.bf16.xpose.msra.mxu1 %v4575_v34  ;;  %v2893_v2 = vpop.f32.mrf.mxu0  ;;  %3159 = vmatprep.subr.bf16.mxu0 %v4578_v43  ;;  %v4582_v10 = vld [vmem:[%s5015_s8 + $0x500] ss:$48 sps:$4 sm:$0xff]   ;;  %v4587_v52 = vld [vmem:[%s5015_s8 + $0x508] ss:$48 sps:$4 sm:$0xff]  }
 0x15b   : > { %v2964_v32 = vpop.f32.mrf.mxu1  ;;  %4268 = vmatprep.subr.msk.bf16.mxu1 %vm2748_vm0, %v4579_v44 }
 0x15c   : > { %v5570_v3 = vadd.f32 %v2964_v32, %v2893_v2  ;;  %v2895_v6 = vpop.f32.mrf.mxu0  ;;  %v4590_v32 = vld [vmem:[%s5015_s8 + $0x4a4] ss:$48 sps:$4 sm:$0xff]  }
 0x15d   : > { %v2966_v13 = vpop.f32.mrf.mxu1 }
 0x15e   : > { %v5572_v18 = vadd.f32 %v2966_v13, %v2895_v6  ;;  %v2897_v25 = vpop.f32.mrf.mxu0  ;;  %v4591_v6 = vld [vmem:[%s5015_s8 + $0x4ac] ss:$48 sps:$4 sm:$0xff]  }
 0x15f   : > { %v2968_v29 = vpop.f32.mrf.mxu1 }
 0x160   : > { %v5578_v5 = vadd.f32 %v2968_v29, %v2897_v25  ;;  %v2901_v38 = vpop.f32.mrf.mxu0 }
 0x161   : > { %v2972_v40 = vpop.f32.mrf.mxu1  ;;  %3160 = vmatpush2.bf16.xpose.msra.mxu0 %v4576_v22 }
 0x162   : > { %3231 = vmatpush2.bf16.xpose.msra.mxu1 %v4581_v49  ;;  %v5580_v4 = vadd.f32 %v2972_v40, %v2901_v38  ;;  %3161 = vmatprep.subr.bf16.mxu0 %v4584_v30  ;;  %v2903_v41 = vpop.f32.mrf.mxu0 }
 0x163   : > { %4269 = vmatprep.subr.msk.bf16.mxu1 %vm2748_vm0, %v4585_v37  ;;  %v2974_v33 = vpop.f32.mrf.mxu1 }
 0x164   : > { %v5583_v34 = vadd.f32 %v2974_v33, %v2903_v41  ;;  %v2905_v43 = vpop.f32.mrf.mxu0 }
 0x165   : > { %v2976_v44 = vpop.f32.mrf.mxu1 }
 0x166   : > { %v5587_v2 = vadd.f32 %v2976_v44, %v2905_v43  ;;  %v2907_v13 = vpop.f32.mrf.mxu0  ;;  %v4588_v43 = vld [vmem:[%s5015_s8 + $0x4a0] ss:$48 sps:$4 sm:$0xff]   ;;  %v4593_v44 = vld [vmem:[%s5015_s8 + $0x4a8] ss:$48 sps:$4 sm:$0xff]  }
 0x167   : > { %v2978_v22 = vpop.f32.mrf.mxu1 }
 0x168   : > { %v5591_v49 = vadd.f32 %v2978_v22, %v2907_v13  ;;  %v2911_v25 = vpop.f32.mrf.mxu0  ;;  %v4596_v22 = vld [vmem:[%s5015_s8 + $0x444] ss:$48 sps:$4 sm:$0xff]  }
 0x169   : > { %v2982_v29 = vpop.f32.mrf.mxu1  ;;  %3162 = vmatpush2.bf16.xpose.msra.mxu0 %v4582_v10 }
 0x16a   : > { %3233 = vmatpush2.bf16.xpose.msra.mxu1 %v4587_v52  ;;  %v5593_v30 = vadd.f32 %v2982_v29, %v2911_v25  ;;  %3163 = vmatprep.subr.bf16.mxu0 %v4590_v32  ;;  %v2913_v37 = vpop.f32.mrf.mxu0 }
 0x16b   : > { %4270 = vmatprep.subr.msk.bf16.mxu1 %vm2748_vm0, %v4591_v6  ;;  %v2984_v38 = vpop.f32.mrf.mxu1 }
 0x16c   : > { %v5596_v40 = vadd.f32 %v2984_v38, %v2913_v37  ;;  %v2915_v41 = vpop.f32.mrf.mxu0 }
 0x16d   : > { %v2986_v33 = vpop.f32.mrf.mxu1 }
 0x16e   : > { %v5600_v13 = vadd.f32 %v2986_v33, %v2915_v41  ;;  %v2917_v10 = vpop.f32.mrf.mxu0 }
 0x16f   : > { %v2988_v52 = vpop.f32.mrf.mxu1 }
 0x170   : > { %v5604_v32 = vadd.f32 %v2988_v52, %v2917_v10  ;;  %v2921_v6 = vpop.f32.mrf.mxu0  ;;  %v4594_v52 = vld [vmem:[%s5015_s8 + $0x440] ss:$48 sps:$4 sm:$0xff]  }
 0x171   : > { %v2992_v25 = vpop.f32.mrf.mxu1  ;;  %3164 = vmatpush2.bf16.xpose.msra.mxu0 %v4588_v43  ;;  %v4603_v43 = vld [vmem:[%s5015_s8 + $0x3ec] ss:$48 sps:$4 sm:$0xff]  }
 0x172   : > { %3235 = vmatpush2.bf16.xpose.msra.mxu1 %v4593_v44  ;;  %v5606_v29 = vadd.f32 %v2992_v25, %v2921_v6  ;;  %3165 = vmatprep.subr.bf16.mxu0 %v4596_v22  ;;  %v2923_v37 = vpop.f32.mrf.mxu0  ;;  %v4605_v6 = vld [vmem:[%s5015_s8 + $0x3e8] ss:$48 sps:$4 sm:$0xff]   ;;  %v4608_v25 = vld [vmem:[%s5015_s8 + $0x384] ss:$48 sps:$4 sm:$0xff]  }
 0x173   : > { %4271 = vmatprep.subr.msk.bf16.mxu1 %vm2748_vm0, %v4597_v24  ;;  %v2994_v38 = vpop.f32.mrf.mxu1  ;;  %v4600_v24 = vld [vmem:[%s5015_s8 + $0x3e0] ss:$48 sps:$4 sm:$0xff]  }
 0x174   : > { %v5609_v41 = vadd.f32 %v2994_v38, %v2923_v37  ;;  %v2925_v33 = vpop.f32.mrf.mxu0  ;;  %v4609_v37 = vld [vmem:[%s5015_s8 + $0x38c] ss:$48 sps:$4 sm:$0xff]   ;;  %v4606_v38 = vld [vmem:[%s5015_s8 + $0x380] ss:$48 sps:$4 sm:$0xff]  }
 0x175   : > { %v2996_v10 = vpop.f32.mrf.mxu1  ;;  %v4611_v33 = vld [vmem:[%s5015_s8 + $0x388] ss:$48 sps:$4 sm:$0xff]  }
 0x176   : > { %v2926_v44 = vpop.f32.mrf.mxu0  ;;  %v4614_v10 = vld [vmem:[%s5015_s8 + $0x324] ss:$48 sps:$4 sm:$0xff]  }
 0x177   : > { %v2997_v22 = vpop.f32.mrf.mxu1 }
 0x178   : > { %v4612_v22 = vld [vmem:[%s5015_s8 + $0x320] ss:$48 sps:$4 sm:$0xff]  }
 0x179   : > { %3166 = vmatpush2.bf16.xpose.msra.mxu0 %v4594_v52 }
 0x17a   : > { %3237 = vmatpush2.bf16.xpose.msra.mxu1 %v4599_v23  ;;  %3167 = vmatprep.subr.bf16.mxu0 %v4602_v31  ;;  %v4615_v23 = vld [vmem:[%s5015_s8 + $0x32c] ss:$48 sps:$4 sm:$0xff]   ;;  %v6289_v31 = vsub.s32 0, %v4981_v1 }
 0x17b   : > { %4272 = vmatprep.subr.msk.bf16.mxu1 %vm2748_vm0, %v4603_v43  ;;  %v6290_v43 = vsub.s32 2, %v4981_v1  ;;  %v218_v1 = vld [vmem:[%s6260_s0 + $0xb0] sm:$0xff] }
 0x17c   : > { %v5629_v52 = vrot.slane %v5469_v12, %v6289_v31 }
 0x17d   : > { %v5634_v44 = vrot.slane %v5469_v12, %v6290_v43  ;;  %v4620_v12 = vld [vmem:[%s5015_s8 + $0x8a4] ss:$48 sps:$4 sm:$0xff]  }
 0x17f   : > { %v366_v62 = vmul.f32 %v5634_v44, %v218_v1  ;;  %v391_v1 = vmul.f32 %v5489_v26, %v243_v47  ;;  %v242_v47 = vld [vmem:[%s6260_s0 + $0x170] sm:$0xff] }
 0x181   : > { %3168 = vmatpush2.bf16.xpose.msra.mxu0 %v4600_v24  ;;  %v4617_v24 = vld [vmem:[%s5015_s8 + $0x328] ss:$48 sps:$4 sm:$0xff]  }
 0x182   : > { %3239 = vmatpush2.bf16.xpose.msra.mxu1 %v4605_v6  ;;  %3169 = vmatprep.subr.bf16.mxu0 %v4608_v25  ;;  %v204_v6 = vld [vmem:[%s6260_s0 + $0x40] sm:$0xff] }
 0x183   : > { %4273 = vmatprep.subr.msk.bf16.mxu1 %vm2748_vm0, %v4609_v37  ;;  %v216_v25 = vld [vmem:[%s6260_s0 + $0xa0] sm:$0xff]  ;;  %v206_v37 = vld [vmem:[%s6260_s0 + $0x50] sm:$0xff] }
 0x184   : > { %v364_v31 = vmul.f32 %v5629_v52, %v216_v25  ;;  %v354_v43 = vmul.f32 %v5634_v44, %v206_v37  ;;  %v379_v37 = vmul.f32 %v5489_v26, %v231_v48  ;;  %v230_v48 = vld [vmem:[%s6260_s0 + $0x110] sm:$0xff] }
 0x186   : > { %v5674_v56 = vpack.c.bf16 %v366_v62, %v354_v43 }
 0x188   : > { %6291 = vst [vmem:[#allocation11_spill] sm:$0xff] %v5674_v56 }
 0x189   : > { %3170 = vmatpush2.bf16.xpose.msra.mxu0 %v4606_v38  ;;  %v4623_v38 = vld [vmem:[%s5015_s8 + $0x8ac] ss:$48 sps:$4 sm:$0xff]  }
 0x18a   : > { %3241 = vmatpush2.bf16.xpose.msra.mxu1 %v4611_v33  ;;  %3171 = vmatprep.subr.bf16.mxu0 %v4614_v10  ;;  %v229_v33 = vld [vmem:[%s6260_s0 + $0x108] sm:$0xff] }
 0x18b   : > { %4274 = vmatprep.subr.msk.bf16.mxu1 %vm2748_vm0, %v4615_v23  ;;  %v241_v10 = vld [vmem:[%s6260_s0 + $0x168] sm:$0xff]  ;;  %v352_v23 = vmul.f32 %v5629_v52, %v204_v6  ;;  %v377_v6 = vmul.f32 %v5500_v36, %v229_v33 }
 0x18c   : > { %v389_v25 = vmul.f32 %v5500_v36, %v241_v10  ;;  %v4629_v33 = vld [vmem:[%s5015_s8 + $0x84c] ss:$48 sps:$4 sm:$0xff]   ;;  %v5695_v10 = vpack.c.bf16 %v391_v1, %v379_v37 }
 0x18d   : > { %v5672_v35 = vpack.c.bf16 %v364_v31, %v352_v23  ;;  %v253_v23 = vld [vmem:[%s6260_s0 + $0x1c8] sm:$0xff]  ;;  %v255_v37 = vld [vmem:[%s6260_s0 + $0x1d8] sm:$0xff] }
 0x18e   : > { %v5690_v62 = vpack.c.bf16 %v389_v25, %v377_v6  ;;  %6293 = vst [vmem:[#allocation13_spill] sm:$0xff] %v5695_v10  ;;  %v265_v31 = vld [vmem:[%s6260_s0 + $0x228] sm:$0xff]  ;;  %v378_v6 = vmul.f32 %v5634_v44, %v230_v48  ;;  %v390_v25 = vmul.f32 %v5634_v44, %v242_v47  ;;  %v267_v1 = vld [vmem:[%s6260_s0 + $0x238] sm:$0xff]  ;;  %v403_v48 = vmul.f32 %v5489_v26, %v255_v37 }
 0x18f   : > { %v415_v47 = vmul.f32 %v5489_v26, %v267_v1  ;;  %v277_v1 = vld [vmem:[%s6260_s0 + $0x288] sm:$0x1] }
 0x190   : > { %6292 = vst [vmem:[#allocation12_spill] sm:$0xff] %v5690_v62 }
 0x191   : > { %3172 = vmatpush2.bf16.xpose.msra.mxu0 %v4612_v22  ;;  %v228_v22 = vld [vmem:[%s6260_s0 + $0x100] sm:$0xff]  ;;  %v5744_v37 = vpack.c.bf16 %v415_v47, %v403_v48  ;;  %v279_v48 = vld [vmem:[%s6260_s0 + $0x298] sm:$0x1]  ;;  %v425_v47 = vmul.f32 %v5500_v36, %v277_v1 }
 0x192   : > { %3243 = vmatpush2.bf16.xpose.msra.mxu1 %v4617_v24  ;;  %3283 = vmatprep.subr.bf16.mxu0 %v4620_v12  ;;  %v240_v24 = vld [vmem:[%s6260_s0 + $0x160] sm:$0xff] }
 0x193   : > { %3354 = vmatprep.subr.bf16.mxu1 %v4623_v38  ;;  %v4626_v12 = vld [vmem:[%s5015_s8 + $0x844] ss:$48 sps:$4 sm:$0xff]   ;;  %v376_v38 = vmul.f32 %v5629_v52, %v228_v22  ;;  %v388_v43 = vmul.f32 %v5629_v52, %v240_v24  ;;  %v401_v22 = vmul.f32 %v5500_v36, %v253_v23  ;;  %v413_v24 = vmul.f32 %v5500_v36, %v265_v31  ;;  %v278_v36 = vld [vmem:[%s6260_s0 + $0x290] sm:$0x1] }
 0x194   : > { %v254_v23 = vld [vmem:[%s6260_s0 + $0x1d0] sm:$0xff] }
 0x195   : > { %v5739_v31 = vpack.c.bf16 %v413_v24, %v401_v22  ;;  %v402_v22 = vmul.f32 %v5634_v44, %v254_v23  ;;  %v4630_v23 = vld [vmem:[%s5015_s8 + $0x7e0] ss:$48 sps:$4 sm:$0xff]  }
 0x198   : > { %3174 = vmatmul.mubr.bf16.vlgmr.msra.gmra.mxu0 %v5672_v35 }
 0x199   : > { %3245 = vmatmul.mubr.bf16.vlgmr.msra.gmra.mxu1 %v5674_v56  ;;  %3284 = vmatpush1.bf16.xpose.msra.mxu0 %v4618_v21  ;;  %v5721_v56 = vpack.c.bf16 %v388_v43, %v376_v38  ;;  %v4627_v21 = vld [vmem:[%s5015_s8 + $0x848] ss:$48 sps:$4 sm:$0xff]   ;;  %v266_v38 = vld [vmem:[%s6260_s0 + $0x230] sm:$0xff] }
 0x19a   : > { %3355 = vmatpush1.bf16.xpose.msra.mxu1 %v4621_v14  ;;  %3183 = vmatprep.mubr.bf16.mxu0 %v5690_v62  ;;  %v4624_v14 = vld [vmem:[%s5015_s8 + $0x840] ss:$48 sps:$4 sm:$0xff]   ;;  %v5725_v62 = vpack.c.bf16 %v390_v25, %v378_v6  ;;  %v4632_v43 = vld [vmem:[%s5015_s8 + $0x7e4] ss:$48 sps:$4 sm:$0xff]   ;;  %v4635_v25 = vld [vmem:[%s5015_s8 + $0x7ec] ss:$48 sps:$4 sm:$0xff]   ;;  %v414_v24 = vmul.f32 %v5634_v44, %v266_v38 }
 0x19b   : > { %3285 = vmatprep.subr.bf16.mxu0 %v4626_v12  ;;  %3356 = vmatprep.subr.bf16.mxu1 %v4629_v33  ;;  %v252_v12 = vld [vmem:[%s6260_s0 + $0x1c0] sm:$0xff] }
 0x19c   : > { %4276 = vmatprep.mubr.msk.bf16.mxu1 %vm2748_vm0, %v5695_v10  ;;  %6294 = vst [vmem:[#allocation14_spill] sm:$0xff] %v5725_v62  ;;  %v264_v33 = vld [vmem:[%s6260_s0 + $0x220] sm:$0xff]  ;;  %v400_v6 = vmul.f32 %v5629_v52, %v252_v12  ;;  %v427_v12 = vmul.f32 %v5489_v26, %v279_v48  ;;  %v5765_v38 = vpack.c.bf16 %v414_v24, %v402_v22  ;;  %v4641_v26 = vld [vmem:[%s5015_s8 + $0x78c] ss:$48 sps:$4 sm:$0xff]   ;;  %v4639_v24 = vld [vmem:[%s5015_s8 + $0x788] ss:$48 sps:$4 sm:$0xff]  }
 0x19d   : > { %v412_v10 = vmul.f32 %v5629_v52, %v264_v33  ;;  %v4647_v48 = vld [vmem:[%s5015_s8 + $0x72c] ss:$48 sps:$4 sm:$0xff]  }
 0x19f   : > { %v5762_v33 = vpack.c.bf16 %v412_v10, %v400_v6  ;;  %v5778_v10 = vpack.c.bf16 %v427_v12, %v427_v12  ;;  %v4650_v12 = vld [vmem:[%s5015_s8 + $0x6c4] ss:$48 sps:$4 sm:$0xff]  }
 0x1a0   : > { %3184 = vmatmul.mubr.bf16.gmra.mxu0 %v5721_v56 }
 0x1a1   : > { %3255 = vmatmul.mubr.bf16.gmra.mxu1 %v5725_v62  ;;  %3286 = vmatpush1.bf16.xpose.msra.mxu0 %v4624_v14  ;;  %v4633_v62 = vld [vmem:[%s5015_s8 + $0x7e8] ss:$48 sps:$4 sm:$0xff]   ;;  %v276_v14 = vld [vmem:[%s6260_s0 + $0x280] sm:$0x1] }
 0x1a2   : > { %3357 = vmatpush1.bf16.xpose.msra.mxu1 %v4627_v21  ;;  %3193 = vmatprep.mubr.bf16.mxu0 %v5739_v31  ;;  %v5774_v21 = vpack.c.bf16 %v425_v47, %v425_v47  ;;  %v424_v6 = vmul.f32 %v5629_v52, %v276_v14  ;;  %v4636_v52 = vld [vmem:[%s5015_s8 + $0x780] ss:$48 sps:$4 sm:$0xff]   ;;  %v4645_v47 = vld [vmem:[%s5015_s8 + $0x728] ss:$48 sps:$4 sm:$0xff]  }
 0x1a3   : > { %3287 = vmatprep.subr.bf16.mxu0 %v4632_v43  ;;  %3358 = vmatprep.subr.bf16.mxu1 %v4635_v25  ;;  %v4638_v43 = vld [vmem:[%s5015_s8 + $0x784] ss:$48 sps:$4 sm:$0xff]   ;;  %v426_v25 = vmul.f32 %v5634_v44, %v278_v36  ;;  %v4648_v14 = vld [vmem:[%s5015_s8 + $0x6c0] ss:$48 sps:$4 sm:$0xff]   ;;  %v4651_v36 = vld [vmem:[%s5015_s8 + $0x6c8] ss:$48 sps:$4 sm:$0xff]  }
 0x1a4   : > { %4277 = vmatprep.mubr.msk.bf16.mxu1 %vm2748_vm0, %v5744_v37  ;;  %v5787_v1 = vpack.c.bf16 %v424_v6, %v424_v6  ;;  %v4644_v44 = vld [vmem:[%s5015_s8 + $0x724] ss:$48 sps:$4 sm:$0xff]  }
 0x1a5   : > { %v5789_v22 = vpack.c.bf16 %v426_v25, %v426_v25  ;;  %v4662_v6 = vld [vmem:[%s5015_s8 + $0x604] ss:$48 sps:$4 sm:$0xff]   ;;  %v4665_v25 = vld [vmem:[%s5015_s8 + $0x60c] ss:$48 sps:$4 sm:$0xff]  }
 0x1a6   : > { %6295 = vst [vmem:[#allocation15_spill] sm:$0xff] %v5787_v1 }
 0x1a7   : > { %6296 = vst [vmem:[#allocation16_spill] sm:$0xff] %v5789_v22 }
 0x1a8   : > { %3194 = vmatmul.mubr.bf16.gmra.mxu0 %v5762_v33 }
 0x1a9   : > { %3265 = vmatmul.mubr.bf16.gmra.mxu1 %v5765_v38  ;;  %3288 = vmatpush1.bf16.xpose.msra.mxu0 %v4630_v23  ;;  %v4653_v23 = vld [vmem:[%s5015_s8 + $0x6cc] ss:$48 sps:$4 sm:$0xff]  }
 0x1aa   : > { %3359 = vmatpush1.bf16.xpose.msra.mxu1 %v4633_v62  ;;  %3203 = vmatprep.mubr.bf16.mxu0 %v5774_v21  ;;  %v4642_v62 = vld [vmem:[%s5015_s8 + $0x720] ss:$48 sps:$4 sm:$0xff]  }
 0x1ab   : > { %3289 = vmatprep.subr.bf16.mxu0 %v4638_v43  ;;  %3360 = vmatprep.subr.bf16.mxu1 %v4641_v26  ;;  %v4656_v43 = vld [vmem:[%s5015_s8 + $0x664] ss:$48 sps:$4 sm:$0xff]   ;;  %v4657_v26 = vld [vmem:[%s5015_s8 + $0x668] ss:$48 sps:$4 sm:$0xff]  }
 0x1ac   : > { %4278 = vmatprep.mubr.msk.bf16.mxu1 %vm2748_vm0, %v5778_v10 }
 0x1b0   : > { %3204 = vmatmul.mubr.bf16.gmra.mxu0 %v5787_v1 }
 0x1b1   : > { %3275 = vmatmul.mubr.bf16.gmra.mxu1 %v5789_v22  ;;  %3290 = vmatpush1.bf16.xpose.msra.mxu0 %v4636_v52  ;;  %v4660_v52 = vld [vmem:[%s5015_s8 + $0x600] ss:$48 sps:$4 sm:$0xff]   ;;  %v4683_v22 = vld [vmem:[%s5015_s8 + $0xaec] ss:$48 sps:$4 sm:$0xff]  }
 0x1b2   : > { %3361 = vmatpush1.bf16.xpose.msra.mxu1 %v4639_v24  ;;  %3291 = vmatprep.subr.bf16.mxu0 %v4644_v44  ;;  %v4663_v24 = vld [vmem:[%s5015_s8 + $0x608] ss:$48 sps:$4 sm:$0xff]   ;;  %v4668_v44 = vld [vmem:[%s5015_s8 + $0xba4] ss:$48 sps:$4 sm:$0xff]  }
 0x1b3   : > { %3362 = vmatprep.subr.bf16.mxu1 %v4647_v48  ;;  %3315 = vmatprep.mubr.bf16.mxu0 %v5025_v19  ;;  %v4659_v19 = vld [vmem:[%s5015_s8 + $0x66c] ss:$48 sps:$4 sm:$0xff]  }
 0x1b4   : > { %3386 = vmatprep.mubr.bf16.mxu1 %v5027_v20  ;;  %v4654_v20 = vld [vmem:[%s5015_s8 + $0x660] ss:$48 sps:$4 sm:$0xff]   ;;  %v4671_v48 = vld [vmem:[%s5015_s8 + $0xbac] ss:$48 sps:$4 sm:$0xff]  }
 0x1b9   : > { %3292 = vmatpush1.bf16.xpose.msra.mxu0 %v4642_v62  ;;  %v4666_v62 = vld [vmem:[%s5015_s8 + $0xba0] ss:$48 sps:$4 sm:$0xff]  }
 0x1ba   : > { %3363 = vmatpush1.bf16.xpose.msra.mxu1 %v4645_v47  ;;  %3293 = vmatprep.subr.bf16.mxu0 %v4650_v12  ;;  %v4669_v47 = vld [vmem:[%s5015_s8 + $0xba8] ss:$48 sps:$4 sm:$0xff]   ;;  %v4674_v12 = vld [vmem:[%s5015_s8 + $0xb44] ss:$48 sps:$4 sm:$0xff]  }
 0x1bb   : > { %3364 = vmatprep.subr.bf16.mxu1 %v4653_v23  ;;  %v4677_v23 = vld [vmem:[%s5015_s8 + $0xb4c] ss:$48 sps:$4 sm:$0xff]  }
 0x1c1   : > { %3294 = vmatpush1.bf16.xpose.msra.mxu0 %v4648_v14 }
 0x1c2   : > { %3365 = vmatpush1.bf16.xpose.msra.mxu1 %v4651_v36  ;;  %3295 = vmatprep.subr.bf16.mxu0 %v4656_v43 }
 0x1c3   : > { %3366 = vmatprep.subr.bf16.mxu1 %v4659_v19 }
 0x1c9   : > { %3296 = vmatpush1.bf16.xpose.msra.mxu0 %v4654_v20 }
 0x1ca   : > { %3367 = vmatpush1.bf16.xpose.msra.mxu1 %v4657_v26  ;;  %3297 = vmatprep.subr.bf16.mxu0 %v4662_v6 }
 0x1cb   : > { %3368 = vmatprep.subr.bf16.mxu1 %v4665_v25 }
 0x1d1   : > { %3298 = vmatpush1.bf16.xpose.msra.mxu0 %v4660_v52 }
 0x1d2   : > { %3369 = vmatpush1.bf16.xpose.msra.mxu1 %v4663_v24  ;;  %3299 = vmatprep.subr.bf16.mxu0 %v4668_v44 }
 0x1d3   : > { %3370 = vmatprep.subr.bf16.mxu1 %v4671_v48  ;;  %v4672_v48 = vld [vmem:[%s5015_s8 + $0xb40] ss:$48 sps:$4 sm:$0xff]  }
 0x1d8   : > { %v3033_v14 = vpop.f32.mrf.mxu0 }
 0x1d9   : > { %v3104_v36 = vpop.f32.mrf.mxu1  ;;  %v3034_v43 = vadd.f32 %v3033_v14, %v5567_v55  ;;  %3300 = vmatpush2.bf16.xpose.msra.mxu0 %v4666_v62  ;;  %v4675_v55 = vld [vmem:[%s5015_s8 + $0xb48] ss:$48 sps:$4 sm:$0xff]  }
 0x1da   : > { %3371 = vmatpush2.bf16.xpose.msra.mxu1 %v4669_v47  ;;  %v3035_v19 = vpop.f32.mrf.mxu0  ;;  %3301 = vmatprep.subr.bf16.mxu0 %v4674_v12  ;;  %v4680_v47 = vld [vmem:[%s5015_s8 + $0xae4] ss:$48 sps:$4 sm:$0xff]  }
 0x1db   : > { %v3106_v20 = vpop.f32.mrf.mxu1  ;;  %3372 = vmatprep.subr.bf16.mxu1 %v4677_v23  ;;  %v5820_v26 = vadd.f32 %v3104_v36, %v3034_v43  ;;  %v3036_v6 = vadd.f32 %v3035_v19, %v5570_v3 }
 0x1dc   : > { %v3037_v25 = vpop.f32.mrf.mxu0 }
 0x1dd   : > { %v3108_v52 = vpop.f32.mrf.mxu1  ;;  %v5823_v24 = vadd.f32 %v3106_v20, %v3036_v6  ;;  %v3038_v44 = vadd.f32 %v3037_v25, %v5572_v18 }
 0x1de   : > { %v3039_v62 = vpop.f32.mrf.mxu0 }
 0x1df   : > { %v3110_v14 = vpop.f32.mrf.mxu1  ;;  %v5830_v1 = vadd.f32 %v3108_v52, %v3038_v44  ;;  %v3040_v12 = vadd.f32 %v3039_v62, %v5578_v5  ;;  %v4678_v62 = vld [vmem:[%s5015_s8 + $0xae0] ss:$48 sps:$4 sm:$0xff]  }
 0x1e0   : > { %v3043_v23 = vpop.f32.mrf.mxu0 }
 0x1e1   : > { %v3114_v36 = vpop.f32.mrf.mxu1  ;;  %v5833_v3 = vadd.f32 %v3110_v14, %v3040_v12  ;;  %v3044_v43 = vadd.f32 %v3043_v23, %v5580_v4  ;;  %3302 = vmatpush2.bf16.xpose.msra.mxu0 %v4672_v48  ;;  %v4681_v4 = vld [vmem:[%s5015_s8 + $0xae8] ss:$48 sps:$4 sm:$0xff]   ;;  %v4689_v12 = vld [vmem:[%s5015_s8 + $0xa8c] ss:$48 sps:$4 sm:$0xff]  }
 0x1e2   : > { %3373 = vmatpush2.bf16.xpose.msra.mxu1 %v4675_v55  ;;  %v3045_v18 = vpop.f32.mrf.mxu0  ;;  %3303 = vmatprep.subr.bf16.mxu0 %v4680_v47  ;;  %v4686_v55 = vld [vmem:[%s5015_s8 + $0xa84] ss:$48 sps:$4 sm:$0xff]  }
 0x1e3   : > { %v3116_v19 = vpop.f32.mrf.mxu1  ;;  %3374 = vmatprep.subr.bf16.mxu1 %v4683_v22  ;;  %v3046_v20 = vadd.f32 %v3045_v18, %v5583_v34  ;;  %v5837_v6 = vadd.f32 %v3114_v36, %v3044_v43 }
 0x1e4   : > { %v3047_v5 = vpop.f32.mrf.mxu0 }
 0x1e5   : > { %v3118_v25 = vpop.f32.mrf.mxu1  ;;  %v3048_v52 = vadd.f32 %v3047_v5, %v5587_v2  ;;  %v5840_v44 = vadd.f32 %v3116_v19, %v3046_v20 }
 0x1e6   : > { %v3049_v48 = vpop.f32.mrf.mxu0 }
 0x1e7   : > { %v3120_v14 = vpop.f32.mrf.mxu1  ;;  %v3050_v23 = vadd.f32 %v3049_v48, %v5591_v49  ;;  %v5847_v47 = vadd.f32 %v3118_v25, %v3048_v52  ;;  %v4687_v48 = vld [vmem:[%s5015_s8 + $0xa88] ss:$48 sps:$4 sm:$0xff]  }
 0x1e8   : > { %v3053_v22 = vpop.f32.mrf.mxu0 }
 0x1e9   : > { %v3124_v34 = vpop.f32.mrf.mxu1  ;;  %v3054_v36 = vadd.f32 %v3053_v22, %v5593_v30  ;;  %v5850_v43 = vadd.f32 %v3120_v14, %v3050_v23  ;;  %3304 = vmatpush2.bf16.xpose.msra.mxu0 %v4678_v62  ;;  %v4684_v30 = vld [vmem:[%s5015_s8 + $0xa80] ss:$48 sps:$4 sm:$0xff]   ;;  %v4695_v23 = vld [vmem:[%s5015_s8 + $0xa2c] ss:$48 sps:$4 sm:$0xff]  }
 0x1ea   : > { %3375 = vmatpush2.bf16.xpose.msra.mxu1 %v4681_v4  ;;  %v3055_v2 = vpop.f32.mrf.mxu0  ;;  %3305 = vmatprep.subr.bf16.mxu0 %v4686_v55  ;;  %v4692_v4 = vld [vmem:[%s5015_s8 + $0xa24] ss:$48 sps:$4 sm:$0xff]  }
 0x1eb   : > { %v3126_v18 = vpop.f32.mrf.mxu1  ;;  %3376 = vmatprep.subr.bf16.mxu1 %v4689_v12  ;;  %v3056_v49 = vadd.f32 %v3055_v2, %v5596_v40  ;;  %v5853_v19 = vadd.f32 %v3124_v34, %v3054_v36 }
 0x1ec   : > { %v3057_v20 = vpop.f32.mrf.mxu0 }
 0x1ed   : > { %v3128_v5 = vpop.f32.mrf.mxu1  ;;  %v3058_v25 = vadd.f32 %v3057_v20, %v5600_v13  ;;  %v5856_v52 = vadd.f32 %v3126_v18, %v3056_v49 }
 0x1ee   : > { %v3059_v62 = vpop.f32.mrf.mxu0 }
 0x1ef   : > { %v3130_v14 = vpop.f32.mrf.mxu1  ;;  %v3060_v22 = vadd.f32 %v3059_v62, %v5604_v32  ;;  %v5863_v55 = vadd.f32 %v3128_v5, %v3058_v25  ;;  %v4690_v5 = vld [vmem:[%s5015_s8 + $0xa20] ss:$48 sps:$4 sm:$0xff]   ;;  %v4693_v25 = vld [vmem:[%s5015_s8 + $0xa28] ss:$48 sps:$4 sm:$0xff]  }
 0x1f0   : > { %v3063_v40 = vpop.f32.mrf.mxu0 }
 0x1f1   : > { %v3134_v12 = vpop.f32.mrf.mxu1  ;;  %v3064_v34 = vadd.f32 %v3063_v40, %v5606_v29  ;;  %v5866_v13 = vadd.f32 %v3130_v14, %v3060_v22  ;;  %3306 = vmatpush2.bf16.xpose.msra.mxu0 %v4684_v30  ;;  %v4698_v30 = vld [vmem:[%s5015_s8 + $0x9c4] ss:$48 sps:$4 sm:$0xff]   ;;  %v4707_v22 = vld [vmem:[%s5015_s8 + $0x96c] ss:$48 sps:$4 sm:$0xff]   ;;  %v4702_v40 = vld [vmem:[%s5015_s8 + $0x960] ss:$48 sps:$4 sm:$0xff]  }
 0x1f2   : > { %3377 = vmatpush2.bf16.xpose.msra.mxu1 %v4687_v48  ;;  %v3065_v36 = vpop.f32.mrf.mxu0  ;;  %3307 = vmatprep.subr.bf16.mxu0 %v4692_v4  ;;  %v4701_v48 = vld [vmem:[%s5015_s8 + $0x9cc] ss:$48 sps:$4 sm:$0xff]   ;;  %v4699_v4 = vld [vmem:[%s5015_s8 + $0x9c8] ss:$48 sps:$4 sm:$0xff]  }
 0x1f3   : > { %v3136_v2 = vpop.f32.mrf.mxu1  ;;  %3378 = vmatprep.subr.bf16.mxu1 %v4695_v23  ;;  %v3066_v32 = vadd.f32 %v3065_v36, %v5609_v41  ;;  %v5869_v18 = vadd.f32 %v3134_v12, %v3064_v34  ;;  %v4696_v41 = vld [vmem:[%s5015_s8 + $0x9c0] ss:$48 sps:$4 sm:$0xff]   ;;  %v4704_v23 = vld [vmem:[%s5015_s8 + $0x964] ss:$48 sps:$4 sm:$0xff]   ;;  %v4705_v12 = vld [vmem:[%s5015_s8 + $0x968] ss:$48 sps:$4 sm:$0xff]  }
 0x1f4   : > { %v3067_v49 = vpop.f32.mrf.mxu0  ;;  %v4710_v34 = vld [vmem:[%s5015_s8 + $0x904] ss:$48 sps:$4 sm:$0xff]   ;;  %v4713_v36 = vld [vmem:[%s5015_s8 + $0x90c] ss:$48 sps:$4 sm:$0xff]  }
 0x1f5   : > { %v3138_v20 = vpop.f32.mrf.mxu1  ;;  %v5871_v29 = vadd.f32 %v3136_v2, %v3066_v32  ;;  %v4708_v2 = vld [vmem:[%s5015_s8 + $0x900] ss:$48 sps:$4 sm:$0xff]   ;;  %v4711_v32 = vld [vmem:[%s5015_s8 + $0x908] ss:$48 sps:$4 sm:$0xff]   ;;  %v4716_v49 = vld [vmem:[%s5015_s8 + $0x8b4] ss:$48 sps:$4 sm:$0xff]  }
 0x1f6   : > { %v3068_v62 = vpop.f32.mrf.mxu0  ;;  %v4719_v20 = vld [vmem:[%s5015_s8 + $0x8bc] ss:$48 sps:$4 sm:$0xff]  }
 0x1f7   : > { %v3139_v14 = vpop.f32.mrf.mxu1  ;;  %v4720_v62 = vld [vmem:[%s5015_s8 + $0x850] ss:$48 sps:$4 sm:$0xff]  }
 0x1f8   : > { %v4723_v14 = vld [vmem:[%s5015_s8 + $0x858] ss:$48 sps:$4 sm:$0xff]  }
 0x1f9   : > { %3308 = vmatpush2.bf16.xpose.msra.mxu0 %v4690_v5  ;;  %v4714_v5 = vld [vmem:[%s5015_s8 + $0x8b0] ss:$48 sps:$4 sm:$0xff]  }
 0x1fa   : > { %3379 = vmatpush2.bf16.xpose.msra.mxu1 %v4693_v25  ;;  %3309 = vmatprep.subr.bf16.mxu0 %v4698_v30  ;;  %v4717_v25 = vld [vmem:[%s5015_s8 + $0x8b8] ss:$48 sps:$4 sm:$0xff]   ;;  %v4722_v30 = vld [vmem:[%s5015_s8 + $0x854] ss:$48 sps:$4 sm:$0xff]  }
 0x1fb   : > { %3380 = vmatprep.subr.bf16.mxu1 %v4701_v48  ;;  %v4725_v48 = vld [vmem:[%s5015_s8 + $0x85c] ss:$48 sps:$4 sm:$0xff]  }
 0x201   : > { %3310 = vmatpush2.bf16.xpose.msra.mxu0 %v4696_v41  ;;  %v4728_v41 = vld [vmem:[%s5015_s8 + $0x7f4] ss:$48 sps:$4 sm:$0xff]  }
 0x202   : > { %3381 = vmatpush2.bf16.xpose.msra.mxu1 %v4699_v4  ;;  %3311 = vmatprep.subr.bf16.mxu0 %v4704_v23  ;;  %v4731_v4 = vld [vmem:[%s5015_s8 + $0x7fc] ss:$48 sps:$4 sm:$0xff]   ;;  %v4752_v23 = vld [vmem:[%s5015_s8 + $0x674] ss:$48 sps:$4 sm:$0xff]  }
 0x203   : > { %3382 = vmatprep.subr.bf16.mxu1 %v4707_v22  ;;  %v4753_v22 = vld [vmem:[%s5015_s8 + $0x678] ss:$48 sps:$4 sm:$0xff]  }
 0x209   : > { %3312 = vmatpush2.bf16.xpose.msra.mxu0 %v4702_v40  ;;  %v4758_v40 = vld [vmem:[%s5015_s8 + $0x614] ss:$48 sps:$4 sm:$0xff]  }
 0x20a   : > { %3383 = vmatpush2.bf16.xpose.msra.mxu1 %v4705_v12  ;;  %3313 = vmatprep.subr.bf16.mxu0 %v4710_v34  ;;  %v4761_v12 = vld [vmem:[%s5015_s8 + $0x61c] ss:$48 sps:$4 sm:$0xff]   ;;  %v4756_v34 = vld [vmem:[%s5015_s8 + $0x610] ss:$48 sps:$4 sm:$0xff]  }
 0x20b   : > { %3384 = vmatprep.subr.bf16.mxu1 %v4713_v36  ;;  %v4759_v36 = vld [vmem:[%s5015_s8 + $0x618] ss:$48 sps:$4 sm:$0xff]  }
 0x211   : > { %3314 = vmatpush2.bf16.xpose.msra.mxu0 %v4708_v2  ;;  %v4764_v2 = vld [vmem:[%s5015_s8 + $0xbb4] ss:$48 sps:$4 sm:$0xff]  }
 0x212   : > { %3385 = vmatpush2.bf16.xpose.msra.mxu1 %v4711_v32  ;;  %3425 = vmatprep.subr.bf16.mxu0 %v4716_v49  ;;  %v4767_v32 = vld [vmem:[%s5015_s8 + $0xbbc] ss:$48 sps:$4 sm:$0xff]   ;;  %v4762_v49 = vld [vmem:[%s5015_s8 + $0xbb0] ss:$48 sps:$4 sm:$0xff]  }
 0x213   : > { %3496 = vmatprep.subr.bf16.mxu1 %v4719_v20  ;;  %v4765_v20 = vld [vmem:[%s5015_s8 + $0xbb8] ss:$48 sps:$4 sm:$0xff]  }
 0x218   : > { %3316 = vmatmul.mubr.bf16.vlgmr.msra.gmra.mxu0 %v5151_v53  ;;  %v4726_v53 = vld [vmem:[%s5015_s8 + $0x7f0] ss:$48 sps:$4 sm:$0xff]  }
 0x219   : > { %3387 = vmatmul.mubr.bf16.vlgmr.msra.gmra.mxu1 %v5153_v54  ;;  %3426 = vmatpush1.bf16.xpose.msra.mxu0 %v4714_v5  ;;  %v4729_v54 = vld [vmem:[%s5015_s8 + $0x7f8] ss:$48 sps:$4 sm:$0xff]   ;;  %v4770_v5 = vld [vmem:[%s5015_s8 + $0xb54] ss:$48 sps:$4 sm:$0xff]  }
 0x21a   : > { %3497 = vmatpush1.bf16.xpose.msra.mxu1 %v4717_v25  ;;  %3427 = vmatprep.subr.bf16.mxu0 %v4722_v30  ;;  %v4773_v25 = vld [vmem:[%s5015_s8 + $0xb5c] ss:$48 sps:$4 sm:$0xff]  }
 0x21b   : > { %3498 = vmatprep.subr.bf16.mxu1 %v4725_v48  ;;  %3325 = vmatprep.mubr.bf16.mxu0 %v5163_v59  ;;  %v4734_v59 = vld [vmem:[%s5015_s8 + $0x794] ss:$48 sps:$4 sm:$0xff]  }
 0x21c   : > { %3396 = vmatprep.mubr.bf16.mxu1 %v5165_v60  ;;  %v4737_v60 = vld [vmem:[%s5015_s8 + $0x79c] ss:$48 sps:$4 sm:$0xff]  }
 0x220   : > { %3326 = vmatmul.mubr.bf16.gmra.mxu0 %v5187_v15  ;;  %v4732_v15 = vld [vmem:[%s5015_s8 + $0x790] ss:$48 sps:$4 sm:$0xff]  }
 0x221   : > { %3397 = vmatmul.mubr.bf16.gmra.mxu1 %v5189_v16  ;;  %3428 = vmatpush1.bf16.xpose.msra.mxu0 %v4720_v62  ;;  %v4735_v16 = vld [vmem:[%s5015_s8 + $0x798] ss:$48 sps:$4 sm:$0xff]  }
 0x222   : > { %3499 = vmatpush1.bf16.xpose.msra.mxu1 %v4723_v14  ;;  %3429 = vmatprep.subr.bf16.mxu0 %v4728_v41 }
 0x223   : > { %3500 = vmatprep.subr.bf16.mxu1 %v4731_v4  ;;  %3335 = vmatprep.mubr.bf16.mxu0 %v5205_v27  ;;  %v4740_v27 = vld [vmem:[%s5015_s8 + $0x734] ss:$48 sps:$4 sm:$0xff]  }
 0x224   : > { %3406 = vmatprep.mubr.bf16.mxu1 %v5207_v28  ;;  %v4743_v28 = vld [vmem:[%s5015_s8 + $0x73c] ss:$48 sps:$4 sm:$0xff]  }
 0x228   : > { %3336 = vmatmul.mubr.bf16.gmra.mxu0 %v5231_v45  ;;  %v4738_v45 = vld [vmem:[%s5015_s8 + $0x730] ss:$48 sps:$4 sm:$0xff]  }
 0x229   : > { %3407 = vmatmul.mubr.bf16.gmra.mxu1 %v5233_v46  ;;  %3430 = vmatpush1.bf16.xpose.msra.mxu0 %v4726_v53  ;;  %v4741_v46 = vld [vmem:[%s5015_s8 + $0x738] ss:$48 sps:$4 sm:$0xff]  }
 0x22a   : > { %3501 = vmatpush1.bf16.xpose.msra.mxu1 %v4729_v54  ;;  %3431 = vmatprep.subr.bf16.mxu0 %v4734_v59 }
 0x22b   : > { %3502 = vmatprep.subr.bf16.mxu1 %v4737_v60  ;;  %3345 = vmatprep.mubr.bf16.mxu0 %v5250_v50  ;;  %v4746_v50 = vld [vmem:[%s5015_s8 + $0x6d4] ss:$48 sps:$4 sm:$0xff]  }
 0x22c   : > { %3416 = vmatprep.mubr.bf16.mxu1 %v5252_v51  ;;  %v4749_v51 = vld [vmem:[%s5015_s8 + $0x6dc] ss:$48 sps:$4 sm:$0xff]  }
 0x230   : > { %3346 = vmatmul.mubr.bf16.gmra.mxu0 %v5274_v63  ;;  %v4744_v63 = vld [vmem:[%s5015_s8 + $0x6d0] ss:$48 sps:$4 sm:$0xff]  }
 0x231   : > { %3417 = vmatmul.mubr.bf16.gmra.mxu1 %v5276_v0  ;;  %3432 = vmatpush1.bf16.xpose.msra.mxu0 %v4732_v15  ;;  %v4747_v0 = vld [vmem:[%s5015_s8 + $0x6d8] ss:$48 sps:$4 sm:$0xff]   ;;  %v4768_v15 = vld [vmem:[%s5015_s8 + $0xb50] ss:$48 sps:$4 sm:$0xff]  }
 0x232   : > { %3503 = vmatpush1.bf16.xpose.msra.mxu1 %v4735_v16  ;;  %3433 = vmatprep.subr.bf16.mxu0 %v4740_v27  ;;  %v4771_v16 = vld [vmem:[%s5015_s8 + $0xb58] ss:$48 sps:$4 sm:$0xff]  }
 0x233   : > { %3504 = vmatprep.subr.bf16.mxu1 %v4743_v28  ;;  %3457 = vmatprep.mubr.bf16.mxu0 %v5281_v8  ;;  %v4755_v8 = vld [vmem:[%s5015_s8 + $0x67c] ss:$48 sps:$4 sm:$0xff]  }
 0x234   : > { %3528 = vmatprep.mubr.bf16.mxu1 %v5283_v11  ;;  %v4750_v11 = vld [vmem:[%s5015_s8 + $0x670] ss:$48 sps:$4 sm:$0xff]  }
 0x239   : > { %3434 = vmatpush1.bf16.xpose.msra.mxu0 %v4738_v45  ;;  %v4776_v45 = vld [vmem:[%s5015_s8 + $0xaf4] ss:$48 sps:$4 sm:$0xff]  }
 0x23a   : > { %3505 = vmatpush1.bf16.xpose.msra.mxu1 %v4741_v46  ;;  %3435 = vmatprep.subr.bf16.mxu0 %v4746_v50  ;;  %v4779_v46 = vld [vmem:[%s5015_s8 + $0xafc] ss:$48 sps:$4 sm:$0xff]  }
 0x23b   : > { %3506 = vmatprep.subr.bf16.mxu1 %v4749_v51 }
 0x241   : > { %3436 = vmatpush1.bf16.xpose.msra.mxu0 %v4744_v63 }
 0x242   : > { %3507 = vmatpush1.bf16.xpose.msra.mxu1 %v4747_v0  ;;  %3437 = vmatprep.subr.bf16.mxu0 %v4752_v23 }
 0x243   : > { %3508 = vmatprep.subr.bf16.mxu1 %v4755_v8 }
 0x249   : > { %3438 = vmatpush1.bf16.xpose.msra.mxu0 %v4750_v11 }
 0x24a   : > { %3509 = vmatpush1.bf16.xpose.msra.mxu1 %v4753_v22  ;;  %3439 = vmatprep.subr.bf16.mxu0 %v4758_v40 }
 0x24b   : > { %3510 = vmatprep.subr.bf16.mxu1 %v4761_v12 }
 0x251   : > { %3440 = vmatpush1.bf16.xpose.msra.mxu0 %v4756_v34  ;;  %v4774_v34 = vld [vmem:[%s5015_s8 + $0xaf0] ss:$48 sps:$4 sm:$0xff]  }
 0x252   : > { %3511 = vmatpush1.bf16.xpose.msra.mxu1 %v4759_v36  ;;  %3441 = vmatprep.subr.bf16.mxu0 %v4764_v2  ;;  %v4777_v36 = vld [vmem:[%s5015_s8 + $0xaf8] ss:$48 sps:$4 sm:$0xff]  }
 0x253   : > { %3512 = vmatprep.subr.bf16.mxu1 %v4767_v32 }
 0x258   : > { %v3175_v30 = vpop.f32.mrf.mxu0 }
 0x259   : > { %v3246_v48 = vpop.f32.mrf.mxu1  ;;  %v3176_v62 = vadd.f32 %v3175_v30, %v5820_v26  ;;  %3442 = vmatpush2.bf16.xpose.msra.mxu0 %v4762_v49  ;;  %v4782_v49 = vld [vmem:[%s5015_s8 + $0xa94] ss:$48 sps:$4 sm:$0xff]  }
 0x25a   : > { %3513 = vmatpush2.bf16.xpose.msra.mxu1 %v4765_v20  ;;  %v3177_v14 = vpop.f32.mrf.mxu0  ;;  %3443 = vmatprep.subr.bf16.mxu0 %v4770_v5  ;;  %v4785_v20 = vld [vmem:[%s5015_s8 + $0xa9c] ss:$48 sps:$4 sm:$0xff]  }
 0x25b   : > { %v3248_v41 = vpop.f32.mrf.mxu1  ;;  %3514 = vmatprep.subr.bf16.mxu1 %v4773_v25  ;;  %v3247_v4 = vadd.f32 %v3246_v48, %v3176_v62  ;;  %v3178_v53 = vadd.f32 %v3177_v14, %v5823_v24 }
 0x25c   : > { %v3179_v54 = vpop.f32.mrf.mxu0 }
 0x25d   : > { %v3250_v59 = vpop.f32.mrf.mxu1  ;;  %3709 = vst [vmem:[%s5944_s12] sm:$0xff] %v3247_v4  ;;  %v3249_v26 = vadd.f32 %v3248_v41, %v3178_v53  ;;  %v3180_v60 = vadd.f32 %v3179_v54, %v5830_v1 }
 0x25e   : > { %v3181_v27 = vpop.f32.mrf.mxu0 }
 0x25f   : > { %v3252_v28 = vpop.f32.mrf.mxu1  ;;  %3710 = vst [vmem:[%s5944_s12 + $0x8] sm:$0xff] %v3249_v26  ;;  %v3251_v24 = vadd.f32 %v3250_v59, %v3180_v60  ;;  %v3182_v50 = vadd.f32 %v3181_v27, %v5833_v3  ;;  %v4780_v59 = vld [vmem:[%s5015_s8 + $0xa90] ss:$48 sps:$4 sm:$0xff]   ;;  %v4783_v26 = vld [vmem:[%s5015_s8 + $0xa98] ss:$48 sps:$4 sm:$0xff]  }
 0x260   : > { %v3185_v51 = vpop.f32.mrf.mxu0  ;;  %v4791_v27 = vld [vmem:[%s5015_s8 + $0xa3c] ss:$48 sps:$4 sm:$0xff]  }
 0x261   : > { %v3256_v63 = vpop.f32.mrf.mxu1  ;;  %3713 = vst [vmem:[%s5944_s12 + $0x20] sm:$0xff] %v3251_v24  ;;  %v3253_v0 = vadd.f32 %v3252_v28, %v3182_v50  ;;  %v3186_v23 = vadd.f32 %v3185_v51, %v5837_v6  ;;  %3444 = vmatpush2.bf16.xpose.msra.mxu0 %v4768_v15 }
 0x262   : > { %3515 = vmatpush2.bf16.xpose.msra.mxu1 %v4771_v16  ;;  %v3187_v1 = vpop.f32.mrf.mxu0  ;;  %3445 = vmatprep.subr.bf16.mxu0 %v4776_v45  ;;  %v4788_v16 = vld [vmem:[%s5015_s8 + $0xa34] ss:$48 sps:$4 sm:$0xff]  }
 0x263   : > { %v3258_v8 = vpop.f32.mrf.mxu1  ;;  %3516 = vmatprep.subr.bf16.mxu1 %v4779_v46  ;;  %3714 = vst [vmem:[%s5944_s12 + $0x28] sm:$0xff] %v3253_v0  ;;  %v3188_v3 = vadd.f32 %v3187_v1, %v5840_v44  ;;  %v3257_v11 = vadd.f32 %v3256_v63, %v3186_v23  ;;  %v4786_v1 = vld [vmem:[%s5015_s8 + $0xa30] ss:$48 sps:$4 sm:$0xff]  }
 0x264   : > { %v3189_v22 = vpop.f32.mrf.mxu0 }
 0x265   : > { %v3260_v40 = vpop.f32.mrf.mxu1  ;;  %3717 = vst [vmem:[%s5944_s12 + $0x40] sm:$0xff] %v3257_v11  ;;  %v3190_v6 = vadd.f32 %v3189_v22, %v5847_v47  ;;  %v3259_v12 = vadd.f32 %v3258_v8, %v3188_v3  ;;  %v4789_v8 = vld [vmem:[%s5015_s8 + $0xa38] ss:$48 sps:$4 sm:$0xff]   ;;  %v4794_v3 = vld [vmem:[%s5015_s8 + $0x9d4] ss:$48 sps:$4 sm:$0xff]  }
 0x266   : > { %v3191_v2 = vpop.f32.mrf.mxu0  ;;  %v4797_v11 = vld [vmem:[%s5015_s8 + $0x9dc] ss:$48 sps:$4 sm:$0xff]  }
 0x267   : > { %v3262_v32 = vpop.f32.mrf.mxu1  ;;  %3718 = vst [vmem:[%s5944_s12 + $0x48] sm:$0xff] %v3259_v12  ;;  %v3192_v5 = vadd.f32 %v3191_v2, %v5850_v43  ;;  %v3261_v25 = vadd.f32 %v3260_v40, %v3190_v6  ;;  %v4795_v6 = vld [vmem:[%s5015_s8 + $0x9d8] ss:$48 sps:$4 sm:$0xff]   ;;  %v4800_v12 = vld [vmem:[%s5015_s8 + $0x974] ss:$48 sps:$4 sm:$0xff]  }
 0x268   : > { %v3195_v44 = vpop.f32.mrf.mxu0  ;;  %v4801_v2 = vld [vmem:[%s5015_s8 + $0x978] ss:$48 sps:$4 sm:$0xff]  }
 0x269   : > { %v3266_v30 = vpop.f32.mrf.mxu1  ;;  %3721 = vst [vmem:[%s5944_s12 + $0x60] sm:$0xff] %v3261_v25  ;;  %v3196_v48 = vadd.f32 %v3195_v44, %v5853_v19  ;;  %v3263_v47 = vadd.f32 %v3262_v32, %v3192_v5  ;;  %3446 = vmatpush2.bf16.xpose.msra.mxu0 %v4774_v34  ;;  %v4803_v34 = vld [vmem:[%s5015_s8 + $0x97c] ss:$48 sps:$4 sm:$0xff]   ;;  %v4806_v32 = vld [vmem:[%s5015_s8 + $0x914] ss:$48 sps:$4 sm:$0xff]  }
 0x26a   : > { %3517 = vmatpush2.bf16.xpose.msra.mxu1 %v4777_v36  ;;  %v3197_v62 = vpop.f32.mrf.mxu0  ;;  %3447 = vmatprep.subr.bf16.mxu0 %v4782_v49  ;;  %v4798_v36 = vld [vmem:[%s5015_s8 + $0x970] ss:$48 sps:$4 sm:$0xff]   ;;  %v4809_v49 = vld [vmem:[%s5015_s8 + $0x91c] ss:$48 sps:$4 sm:$0xff]   ;;  %v4807_v5 = vld [vmem:[%s5015_s8 + $0x918] ss:$48 sps:$4 sm:$0xff]  }
 0x26b   : > { %v3268_v14 = vpop.f32.mrf.mxu1  ;;  %3518 = vmatprep.subr.bf16.mxu1 %v4785_v20  ;;  %3722 = vst [vmem:[%s5944_s12 + $0x68] sm:$0xff] %v3263_v47  ;;  %v3198_v43 = vadd.f32 %v3197_v62, %v5856_v52  ;;  %v3267_v41 = vadd.f32 %v3266_v30, %v3196_v48  ;;  %v4804_v20 = vld [vmem:[%s5015_s8 + $0x910] ss:$48 sps:$4 sm:$0xff]   ;;  %v4812_v25 = vld [vmem:[%s5015_s8 + $0x8c4] ss:$48 sps:$4 sm:$0xff]  }
 0x26c   : > { %v3199_v4 = vpop.f32.mrf.mxu0  ;;  %v4813_v44 = vld [vmem:[%s5015_s8 + $0x8cc] ss:$48 sps:$4 sm:$0xff]   ;;  %v4810_v30 = vld [vmem:[%s5015_s8 + $0x8c0] ss:$48 sps:$4 sm:$0xff]   ;;  %v4815_v48 = vld [vmem:[%s5015_s8 + $0x8c8] ss:$48 sps:$4 sm:$0xff]  }
 0x26d   : > { %v3270_v53 = vpop.f32.mrf.mxu1  ;;  %3725 = vst [vmem:[%s5944_s12 + $0x80] sm:$0xff] %v3267_v41  ;;  %v3200_v19 = vadd.f32 %v3199_v4, %v5863_v55  ;;  %v3269_v54 = vadd.f32 %v3268_v14, %v3198_v43  ;;  %v4818_v47 = vld [vmem:[%s5015_s8 + $0x864] ss:$48 sps:$4 sm:$0xff]   ;;  %v4819_v62 = vld [vmem:[%s5015_s8 + $0x86c] ss:$48 sps:$4 sm:$0xff]  }
 0x26e   : > { %v3201_v60 = vpop.f32.mrf.mxu0  ;;  %v4816_v14 = vld [vmem:[%s5015_s8 + $0x860] ss:$48 sps:$4 sm:$0xff]   ;;  %v4821_v43 = vld [vmem:[%s5015_s8 + $0x868] ss:$48 sps:$4 sm:$0xff]   ;;  %v4824_v41 = vld [vmem:[%s5015_s8 + $0x804] ss:$48 sps:$4 sm:$0xff]  }
 0x26f   : > { %v3272_v15 = vpop.f32.mrf.mxu1  ;;  %3726 = vst [vmem:[%s5944_s12 + $0x88] sm:$0xff] %v3269_v54  ;;  %v3202_v28 = vadd.f32 %v3201_v60, %v5866_v13  ;;  %v3271_v45 = vadd.f32 %v3270_v53, %v3200_v19  ;;  %v4825_v4 = vld [vmem:[%s5015_s8 + $0x80c] ss:$48 sps:$4 sm:$0xff]   ;;  %v4833_v19 = vld [vmem:[%s5015_s8 + $0x7a8] ss:$48 sps:$4 sm:$0xff]  }
 0x270   : > { %v3205_v52 = vpop.f32.mrf.mxu0  ;;  %v6300_v53 = vld [vmem:[#allocation6_spill] sm:$0xff]  ;;  %v4836_v54 = vld [vmem:[%s5015_s8 + $0x744] ss:$48 sps:$4 sm:$0xff]   ;;  %v6302_v60 = vld [vmem:[#allocation8_spill] sm:$0xff] }
 0x271   : > { %v3276_v46 = vpop.f32.mrf.mxu1  ;;  %3729 = vst [vmem:[%s5944_s12 + $0xa0] sm:$0xff] %v3271_v45  ;;  %v3206_v24 = vadd.f32 %v3205_v52, %v5869_v18  ;;  %v3273_v55 = vadd.f32 %v3272_v15, %v3202_v28  ;;  %3448 = vmatpush2.bf16.xpose.msra.mxu0 %v4780_v59  ;;  %v4837_v59 = vld [vmem:[%s5015_s8 + $0x74c] ss:$48 sps:$4 sm:$0xff]   ;;  %v6303_v15 = vld [vmem:[#allocation9_spill] sm:$0xff]  ;;  %v4839_v28 = vld [vmem:[%s5015_s8 + $0x748] ss:$48 sps:$4 sm:$0xff]  }
 0x272   : > { %3519 = vmatpush2.bf16.xpose.msra.mxu1 %v4783_v26  ;;  %v3207_v50 = vpop.f32.mrf.mxu0  ;;  %3449 = vmatprep.subr.bf16.mxu0 %v4788_v16  ;;  %v6301_v26 = vld [vmem:[#allocation7_spill] sm:$0xff]  ;;  %v6304_v16 = vld [vmem:[#allocation10_spill] sm:$0xff] }
 0x273   : > { %v3278_v51 = vpop.f32.mrf.mxu1  ;;  %3520 = vmatprep.subr.bf16.mxu1 %v4791_v27  ;;  %3730 = vst [vmem:[%s5944_s12 + $0xa8] sm:$0xff] %v3273_v55  ;;  %v3208_v13 = vadd.f32 %v3207_v50, %v5871_v29  ;;  %v3277_v63 = vadd.f32 %v3276_v46, %v3206_v24  ;;  %v4792_v29 = vld [vmem:[%s5015_s8 + $0x9d0] ss:$48 sps:$4 sm:$0xff]   ;;  %v4842_v45 = vld [vmem:[%s5015_s8 + $0x6e4] ss:$48 sps:$4 sm:$0xff]  }
 0x274   : > { %v3209_v0 = vpop.f32.mrf.mxu0  ;;  %v4834_v27 = vld [vmem:[%s5015_s8 + $0x740] ss:$48 sps:$4 sm:$0xff]   ;;  %v4843_v52 = vld [vmem:[%s5015_s8 + $0x6ec] ss:$48 sps:$4 sm:$0xff]   ;;  %v4845_v24 = vld [vmem:[%s5015_s8 + $0x6e8] ss:$48 sps:$4 sm:$0xff]  }
 0x275   : > { %v3280_v23 = vpop.f32.mrf.mxu1  ;;  %3733 = vst [vmem:[%s5944_s12 + $0xc0] sm:$0x1] %v3277_v63  ;;  %v3279_v18 = vadd.f32 %v3278_v51, %v3208_v13  ;;  %v4840_v46 = vld [vmem:[%s5015_s8 + $0x6e0] ss:$48 sps:$4 sm:$0xff]   ;;  %v4848_v55 = vld [vmem:[%s5015_s8 + $0x684] ss:$48 sps:$4 sm:$0xff]  }
 0x276   : > { %v3210_v22 = vpop.f32.mrf.mxu0  ;;  %v4849_v50 = vld [vmem:[%s5015_s8 + $0x68c] ss:$48 sps:$4 sm:$0xff]   ;;  %v4846_v51 = vld [vmem:[%s5015_s8 + $0x680] ss:$48 sps:$4 sm:$0xff]   ;;  %v4851_v13 = vld [vmem:[%s5015_s8 + $0x688] ss:$48 sps:$4 sm:$0xff]  }
 0x277   : > { %v3281_v40 = vpop.f32.mrf.mxu1  ;;  %3734 = vst [vmem:[%s5944_s12 + $0xc8] sm:$0x1] %v3279_v18  ;;  %v4854_v63 = vld [vmem:[%s5015_s8 + $0x624] ss:$48 sps:$4 sm:$0xff]   ;;  %v4855_v0 = vld [vmem:[%s5015_s8 + $0x62c] ss:$48 sps:$4 sm:$0xff]  }
 0x278   : > { %v4852_v23 = vld [vmem:[%s5015_s8 + $0x620] ss:$48 sps:$4 sm:$0xff]   ;;  %v4857_v18 = vld [vmem:[%s5015_s8 + $0x628] ss:$48 sps:$4 sm:$0xff]   ;;  %v4866_v22 = vld [vmem:[%s5015_s8 + $0xb64] ss:$48 sps:$4 sm:$0xff]  }
 0x279   : > { %3450 = vmatpush2.bf16.xpose.msra.mxu0 %v4786_v1  ;;  %v4860_v1 = vld [vmem:[%s5015_s8 + $0xbc4] ss:$48 sps:$4 sm:$0xff]   ;;  %v4867_v40 = vld [vmem:[%s5015_s8 + $0xb6c] ss:$48 sps:$4 sm:$0xff]  }
 0x27a   : > { %3521 = vmatpush2.bf16.xpose.msra.mxu1 %v4789_v8  ;;  %3451 = vmatprep.subr.bf16.mxu0 %v4794_v3  ;;  %v4861_v8 = vld [vmem:[%s5015_s8 + $0xbcc] ss:$48 sps:$4 sm:$0xff]   ;;  %v4858_v3 = vld [vmem:[%s5015_s8 + $0xbc0] ss:$48 sps:$4 sm:$0xff]  }
 0x27b   : > { %3522 = vmatprep.subr.bf16.mxu1 %v4797_v11  ;;  %v4863_v11 = vld [vmem:[%s5015_s8 + $0xbc8] ss:$48 sps:$4 sm:$0xff]  }
 0x281   : > { %3452 = vmatpush2.bf16.xpose.msra.mxu0 %v4792_v29 }
 0x282   : > { %3523 = vmatpush2.bf16.xpose.msra.mxu1 %v4795_v6  ;;  %3453 = vmatprep.subr.bf16.mxu0 %v4800_v12 }
 0x283   : > { %3524 = vmatprep.subr.bf16.mxu1 %v4803_v34 }
 0x289   : > { %3454 = vmatpush2.bf16.xpose.msra.mxu0 %v4798_v36 }
 0x28a   : > { %3525 = vmatpush2.bf16.xpose.msra.mxu1 %v4801_v2  ;;  %3455 = vmatprep.subr.bf16.mxu0 %v4806_v32 }
 0x28b   : > { %3526 = vmatprep.subr.bf16.mxu1 %v4809_v49 }
 0x291   : > { %3456 = vmatpush2.bf16.xpose.msra.mxu0 %v4804_v20 }
 0x292   : > { %3527 = vmatpush2.bf16.xpose.msra.mxu1 %v4807_v5  ;;  %3567 = vmatprep.subr.bf16.mxu0 %v4812_v25  ;;  %v4864_v5 = vld [vmem:[%s5015_s8 + $0xb60] ss:$48 sps:$4 sm:$0xff]   ;;  %v4869_v25 = vld [vmem:[%s5015_s8 + $0xb68] ss:$48 sps:$4 sm:$0xff]  }
 0x293   : > { %4279 = vmatprep.subr.msk.bf16.mxu1 %vm2748_vm0, %v4813_v44 }
 0x298   : > { %3458 = vmatmul.mubr.bf16.vlgmr.msra.gmra.mxu0 %v5379_v58  ;;  %v4822_v58 = vld [vmem:[%s5015_s8 + $0x800] ss:$48 sps:$4 sm:$0xff]  }
 0x299   : > { %3529 = vmatmul.mubr.bf16.vlgmr.msra.gmra.mxu1 %v5381_v61  ;;  %3568 = vmatpush1.bf16.xpose.msra.mxu0 %v4810_v30  ;;  %v4827_v61 = vld [vmem:[%s5015_s8 + $0x808] ss:$48 sps:$4 sm:$0xff]  }
 0x29a   : > { %3639 = vmatpush1.bf16.xpose.msra.mxu1 %v4815_v48  ;;  %3467 = vmatprep.mubr.bf16.mxu0 %v5397_v7  ;;  %v4830_v7 = vld [vmem:[%s5015_s8 + $0x7a4] ss:$48 sps:$4 sm:$0xff]  }
 0x29b   : > { %3569 = vmatprep.subr.bf16.mxu0 %v4818_v47  ;;  %4280 = vmatprep.subr.msk.bf16.mxu1 %vm2748_vm0, %v4819_v62  ;;  %v4872_v48 = vld [vmem:[%s5015_s8 + $0xb04] ss:$48 sps:$4 sm:$0xff]   ;;  %v4873_v47 = vld [vmem:[%s5015_s8 + $0xb0c] ss:$48 sps:$4 sm:$0xff]  }
 0x29c   : > { %3538 = vmatprep.mubr.bf16.mxu1 %v5402_v17  ;;  %v4831_v17 = vld [vmem:[%s5015_s8 + $0x7ac] ss:$48 sps:$4 sm:$0xff]  }
 0x2a0   : > { %3468 = vmatmul.mubr.bf16.gmra.mxu0 %v5428_v39  ;;  %v6297_v39 = vld [vmem:[#allocation3_spill] sm:$0xff] }
 0x2a1   : > { %3539 = vmatmul.mubr.bf16.gmra.mxu1 %v5432_v42  ;;  %3570 = vmatpush1.bf16.xpose.msra.mxu0 %v4816_v14  ;;  %v6298_v42 = vld [vmem:[#allocation4_spill] sm:$0xff] }
 0x2a2   : > { %3641 = vmatpush1.bf16.xpose.msra.mxu1 %v4821_v43  ;;  %3477 = vmatprep.mubr.bf16.mxu0 %v5446_v9  ;;  %v6299_v9 = vld [vmem:[#allocation5_spill] sm:$0xff] }
 0x2a3   : > { %3571 = vmatprep.subr.bf16.mxu0 %v4824_v41  ;;  %4281 = vmatprep.subr.msk.bf16.mxu1 %vm2748_vm0, %v4825_v4 }
 0x2a4   : > { %3548 = vmatprep.mubr.bf16.mxu1 %v5451_v57  ;;  %v4828_v57 = vld [vmem:[%s5015_s8 + $0x7a0] ss:$48 sps:$4 sm:$0xff]  }
 0x2a8   : > { %3478 = vmatmul.mubr.bf16.gmra.mxu0 %v6297_v39  ;;  %v4870_v39 = vld [vmem:[%s5015_s8 + $0xb00] ss:$48 sps:$4 sm:$0xff]  }
 0x2a9   : > { %3549 = vmatmul.mubr.bf16.gmra.mxu1 %v6298_v42  ;;  %3572 = vmatpush1.bf16.xpose.msra.mxu0 %v4822_v58  ;;  %v4875_v42 = vld [vmem:[%s5015_s8 + $0xb08] ss:$48 sps:$4 sm:$0xff]  }
 0x2aa   : > { %3643 = vmatpush1.bf16.xpose.msra.mxu1 %v4827_v61  ;;  %3487 = vmatprep.mubr.bf16.mxu0 %v6299_v9 }
 0x2ab   : > { %3573 = vmatprep.subr.bf16.mxu0 %v4830_v7  ;;  %4282 = vmatprep.subr.msk.bf16.mxu1 %vm2748_vm0, %v4831_v17 }
 0x2ac   : > { %3558 = vmatprep.mubr.bf16.mxu1 %v6300_v53  ;;  %v4878_v53 = vld [vmem:[%s5015_s8 + $0xaa4] ss:$48 sps:$4 sm:$0xff]  }
 0x2b0   : > { %3488 = vmatmul.mubr.bf16.gmra.mxu0 %v6301_v26 }
 0x2b1   : > { %3559 = vmatmul.mubr.bf16.gmra.mxu1 %v6302_v60  ;;  %3574 = vmatpush1.bf16.xpose.msra.mxu0 %v4828_v57  ;;  %v4879_v57 = vld [vmem:[%s5015_s8 + $0xaac] ss:$48 sps:$4 sm:$0xff]  }
 0x2b2   : > { %3645 = vmatpush1.bf16.xpose.msra.mxu1 %v4833_v19  ;;  %3575 = vmatprep.subr.bf16.mxu0 %v4836_v54 }
 0x2b3   : > { %4283 = vmatprep.subr.msk.bf16.mxu1 %vm2748_vm0, %v4837_v59  ;;  %3599 = vmatprep.mubr.bf16.mxu0 %v6303_v15 }
 0x2b4   : > { %4295 = vmatprep.mubr.msk.bf16.mxu1 %vm2748_vm0, %v6304_v16 }
 0x2b9   : > { %3576 = vmatpush1.bf16.xpose.msra.mxu0 %v4834_v27 }
 0x2ba   : > { %3647 = vmatpush1.bf16.xpose.msra.mxu1 %v4839_v28  ;;  %3577 = vmatprep.subr.bf16.mxu0 %v4842_v45 }
 0x2bb   : > { %4284 = vmatprep.subr.msk.bf16.mxu1 %vm2748_vm0, %v4843_v52 }
 0x2c1   : > { %3578 = vmatpush1.bf16.xpose.msra.mxu0 %v4840_v46  ;;  %v4876_v46 = vld [vmem:[%s5015_s8 + $0xaa0] ss:$48 sps:$4 sm:$0xff]  }
 0x2c2   : > { %3649 = vmatpush1.bf16.xpose.msra.mxu1 %v4845_v24  ;;  %3579 = vmatprep.subr.bf16.mxu0 %v4848_v55  ;;  %v4881_v24 = vld [vmem:[%s5015_s8 + $0xaa8] ss:$48 sps:$4 sm:$0xff]  }
 0x2c3   : > { %4285 = vmatprep.subr.msk.bf16.mxu1 %vm2748_vm0, %v4849_v50  ;;  %v4884_v50 = vld [vmem:[%s5015_s8 + $0xa44] ss:$48 sps:$4 sm:$0xff]  }
 0x2c9   : > { %3580 = vmatpush1.bf16.xpose.msra.mxu0 %v4846_v51  ;;  %v4885_v51 = vld [vmem:[%s5015_s8 + $0xa4c] ss:$48 sps:$4 sm:$0xff]  }
 0x2ca   : > { %3651 = vmatpush1.bf16.xpose.msra.mxu1 %v4851_v13  ;;  %3581 = vmatprep.subr.bf16.mxu0 %v4854_v63 }
 0x2cb   : > { %4286 = vmatprep.subr.msk.bf16.mxu1 %vm2748_vm0, %v4855_v0 }
 0x2d1   : > { %3582 = vmatpush1.bf16.xpose.msra.mxu0 %v4852_v23 }
 0x2d2   : > { %3653 = vmatpush1.bf16.xpose.msra.mxu1 %v4857_v18  ;;  %3583 = vmatprep.subr.bf16.mxu0 %v4860_v1 }
 0x2d3   : > { %4287 = vmatprep.subr.msk.bf16.mxu1 %vm2748_vm0, %v4861_v8 }
 0x2d8   : > { %v3317_v29 = vpop.f32.mrf.mxu0 }
 0x2d9   : > { %v3388_v6 = vpop.f32.mrf.mxu1  ;;  %3584 = vmatpush2.bf16.xpose.msra.mxu0 %v4858_v3 }
 0x2da   : > { %v6062_v12 = vadd.f32 %v3388_v6, %v3317_v29  ;;  %3655 = vmatpush2.bf16.xpose.msra.mxu1 %v4863_v11  ;;  %v3319_v34 = vpop.f32.mrf.mxu0  ;;  %3585 = vmatprep.subr.bf16.mxu0 %v4866_v22  ;;  %v4882_v29 = vld [vmem:[%s5015_s8 + $0xa40] ss:$48 sps:$4 sm:$0xff]   ;;  %v4887_v6 = vld [vmem:[%s5015_s8 + $0xa48] ss:$48 sps:$4 sm:$0xff]  }
 0x2db   : > { %v3390_v36 = vpop.f32.mrf.mxu1  ;;  %4288 = vmatprep.subr.msk.bf16.mxu1 %vm2748_vm0, %v4867_v40 }
 0x2dc   : > { %v6065_v2 = vadd.f32 %v3390_v36, %v3319_v34  ;;  %v3321_v32 = vpop.f32.mrf.mxu0  ;;  %v4890_v34 = vld [vmem:[%s5015_s8 + $0x9e4] ss:$48 sps:$4 sm:$0xff]   ;;  %v4891_v36 = vld [vmem:[%s5015_s8 + $0x9ec] ss:$48 sps:$4 sm:$0xff]  }
 0x2dd   : > { %v3392_v49 = vpop.f32.mrf.mxu1 }
 0x2de   : > { %v6067_v20 = vadd.f32 %v3392_v49, %v3321_v32  ;;  %v3323_v44 = vpop.f32.mrf.mxu0 }
 0x2df   : > { %v3394_v30 = vpop.f32.mrf.mxu1 }
 0x2e0   : > { %v6073_v62 = vadd.f32 %v3394_v30, %v3323_v44  ;;  %v3327_v14 = vpop.f32.mrf.mxu0  ;;  %v4896_v44 = vld [vmem:[%s5015_s8 + $0x984] ss:$48 sps:$4 sm:$0xff]   ;;  %v4897_v30 = vld [vmem:[%s5015_s8 + $0x98c] ss:$48 sps:$4 sm:$0xff]  }
 0x2e1   : > { %v3398_v43 = vpop.f32.mrf.mxu1  ;;  %3586 = vmatpush2.bf16.xpose.msra.mxu0 %v4864_v5  ;;  %v4888_v5 = vld [vmem:[%s5015_s8 + $0x9e0] ss:$48 sps:$4 sm:$0xff]  }
 0x2e2   : > { %3657 = vmatpush2.bf16.xpose.msra.mxu1 %v4869_v25  ;;  %v6075_v41 = vadd.f32 %v3398_v43, %v3327_v14  ;;  %3587 = vmatprep.subr.bf16.mxu0 %v4872_v48  ;;  %v3329_v4 = vpop.f32.mrf.mxu0  ;;  %v4893_v25 = vld [vmem:[%s5015_s8 + $0x9e8] ss:$48 sps:$4 sm:$0xff]   ;;  %v4894_v48 = vld [vmem:[%s5015_s8 + $0x980] ss:$48 sps:$4 sm:$0xff]   ;;  %v4902_v14 = vld [vmem:[%s5015_s8 + $0x924] ss:$48 sps:$4 sm:$0xff]  }
 0x2e3   : > { %4289 = vmatprep.subr.msk.bf16.mxu1 %vm2748_vm0, %v4873_v47  ;;  %v3400_v58 = vpop.f32.mrf.mxu1  ;;  %v4899_v47 = vld [vmem:[%s5015_s8 + $0x988] ss:$48 sps:$4 sm:$0xff]   ;;  %v4903_v43 = vld [vmem:[%s5015_s8 + $0x92c] ss:$48 sps:$4 sm:$0xff]  }
 0x2e4   : > { %v6078_v61 = vadd.f32 %v3400_v58, %v3329_v4  ;;  %v3331_v7 = vpop.f32.mrf.mxu0  ;;  %v4900_v4 = vld [vmem:[%s5015_s8 + $0x920] ss:$48 sps:$4 sm:$0xff]   ;;  %v4905_v58 = vld [vmem:[%s5015_s8 + $0x928] ss:$48 sps:$4 sm:$0xff]   ;;  %s4303_s8 = sshll.u32 (%p4976_p4), %s4964_s15, 5 }
 0x2e5   : > { %v3402_v17 = vpop.f32.mrf.mxu1  ;;  %s6195_s23 = scalar_lea.vmem (%p4976_p4), %s6263_s3, %s4303_s8 }
 0x2e6   : > { %v6082_v9 = vadd.f32 %v3402_v17, %v3331_v7  ;;  %v3333_v19 = vpop.f32.mrf.mxu0  ;;  %v6305_v7 = vld [vmem:[#allocation11_spill] sm:$0xff]  ;;  %v6306_v17 = vld [vmem:[#allocation12_spill] sm:$0xff] }
 0x2e7   : > { %v3404_v54 = vpop.f32.mrf.mxu1 }
 0x2e8   : > { %v6086_v59 = vadd.f32 %v3404_v54, %v3333_v19  ;;  %v3337_v26 = vpop.f32.mrf.mxu0 }
 0x2e9   : > { %v3408_v60 = vpop.f32.mrf.mxu1  ;;  %3588 = vmatpush2.bf16.xpose.msra.mxu0 %v4870_v39  ;;  %v6307_v39 = vld [vmem:[#allocation13_spill] sm:$0xff] }
 0x2ea   : > { %3659 = vmatpush2.bf16.xpose.msra.mxu1 %v4875_v42  ;;  %v6088_v15 = vadd.f32 %v3408_v60, %v3337_v26  ;;  %3589 = vmatprep.subr.bf16.mxu0 %v4878_v53  ;;  %v3339_v16 = vpop.f32.mrf.mxu0  ;;  %v6308_v42 = vld [vmem:[#allocation14_spill] sm:$0xff]  ;;  %v6310_v53 = vld [vmem:[#allocation16_spill] sm:$0xff] }
 0x2eb   : > { %4290 = vmatprep.subr.msk.bf16.mxu1 %vm2748_vm0, %v4879_v57  ;;  %v3410_v27 = vpop.f32.mrf.mxu1 }
 0x2ec   : > { %v6091_v28 = vadd.f32 %v3410_v27, %v3339_v16  ;;  %v3341_v45 = vpop.f32.mrf.mxu0 }
 0x2ed   : > { %v3412_v52 = vpop.f32.mrf.mxu1 }
 0x2ee   : > { %v6095_v55 = vadd.f32 %v3412_v52, %v3341_v45  ;;  %v3343_v13 = vpop.f32.mrf.mxu0 }
 0x2ef   : > { %v3414_v63 = vpop.f32.mrf.mxu1 }
 0x2f0   : > { %v6099_v0 = vadd.f32 %v3414_v63, %v3343_v13  ;;  %v3347_v23 = vpop.f32.mrf.mxu0 }
 0x2f1   : > { %v3418_v18 = vpop.f32.mrf.mxu1  ;;  %3590 = vmatpush2.bf16.xpose.msra.mxu0 %v4876_v46 }
 0x2f2   : > { %3661 = vmatpush2.bf16.xpose.msra.mxu1 %v4881_v24  ;;  %v6101_v1 = vadd.f32 %v3418_v18, %v3347_v23  ;;  %3591 = vmatprep.subr.bf16.mxu0 %v4884_v50  ;;  %v3349_v8 = vpop.f32.mrf.mxu0 }
 0x2f3   : > { %4291 = vmatprep.subr.msk.bf16.mxu1 %vm2748_vm0, %v4885_v51  ;;  %v3420_v3 = vpop.f32.mrf.mxu1 }
 0x2f4   : > { %v6104_v11 = vadd.f32 %v3420_v3, %v3349_v8  ;;  %v3351_v22 = vpop.f32.mrf.mxu0 }
 0x2f5   : > { %v3422_v40 = vpop.f32.mrf.mxu1 }
 0x2f6   : > { %v3352_v32 = vpop.f32.mrf.mxu0 }
 0x2f7   : > { %v3423_v49 = vpop.f32.mrf.mxu1 }
 0x2f9   : > { %3592 = vmatpush2.bf16.xpose.msra.mxu0 %v4882_v29 }
 0x2fa   : > { %3663 = vmatpush2.bf16.xpose.msra.mxu1 %v4887_v6  ;;  %3593 = vmatprep.subr.bf16.mxu0 %v4890_v34 }
 0x2fb   : > { %4292 = vmatprep.subr.msk.bf16.mxu1 %vm2748_vm0, %v4891_v36 }
 0x301   : > { %3594 = vmatpush2.bf16.xpose.msra.mxu0 %v4888_v5 }
 0x302   : > { %3665 = vmatpush2.bf16.xpose.msra.mxu1 %v4893_v25  ;;  %3595 = vmatprep.subr.bf16.mxu0 %v4896_v44 }
 0x303   : > { %4293 = vmatprep.subr.msk.bf16.mxu1 %vm2748_vm0, %v4897_v30 }
 0x309   : > { %3596 = vmatpush2.bf16.xpose.msra.mxu0 %v4894_v48 }
 0x30a   : > { %3667 = vmatpush2.bf16.xpose.msra.mxu1 %v4899_v47  ;;  %3597 = vmatprep.subr.bf16.mxu0 %v4902_v14 }
 0x30b   : > { %4294 = vmatprep.subr.msk.bf16.mxu1 %vm2748_vm0, %v4903_v43 }
 0x311   : > { %3598 = vmatpush2.bf16.xpose.msra.mxu0 %v4900_v4 }
 0x312   : > { %3669 = vmatpush2.bf16.xpose.msra.mxu1 %v4905_v58 }
 0x318   : > { %3600 = vmatmul.mubr.bf16.vlgmr.msra.gmra.mxu0 %v5672_v35  ;;  %v6309_v35 = vld [vmem:[#allocation15_spill] sm:$0xff] }
 0x319   : > { %3671 = vmatmul.mubr.bf16.vlgmr.msra.gmra.mxu1 %v6305_v7  ;;  %3609 = vmatprep.mubr.bf16.mxu0 %v6306_v17 }
 0x31a   : > { %4296 = vmatprep.mubr.msk.bf16.mxu1 %vm2748_vm0, %v6307_v39 }
 0x320   : > { %3610 = vmatmul.mubr.bf16.gmra.mxu0 %v5721_v56 }
 0x321   : > { %3681 = vmatmul.mubr.bf16.gmra.mxu1 %v6308_v42  ;;  %3619 = vmatprep.mubr.bf16.mxu0 %v5739_v31 }
 0x322   : > { %4297 = vmatprep.mubr.msk.bf16.mxu1 %vm2748_vm0, %v5744_v37 }
 0x328   : > { %3620 = vmatmul.mubr.bf16.gmra.mxu0 %v5762_v33 }
 0x329   : > { %3691 = vmatmul.mubr.bf16.gmra.mxu1 %v5765_v38  ;;  %3629 = vmatprep.mubr.bf16.mxu0 %v5774_v21 }
 0x32a   : > { %4298 = vmatprep.mubr.msk.bf16.mxu1 %vm2748_vm0, %v5778_v10 }
 0x330   : > { %3630 = vmatmul.mubr.bf16.gmra.mxu0 %v6309_v35 }
 0x331   : > { %3701 = vmatmul.mubr.bf16.gmra.mxu1 %v6310_v53 }
 0x358   : > { %v3459_v56 = vpop.f32.mrf.mxu0 }
 0x359   : > { %v3530_v57 = vpop.f32.mrf.mxu1  ;;  %v3460_v31 = vadd.f32 %v3459_v56, %v6062_v12 }
 0x35a   : > { %v3461_v19 = vpop.f32.mrf.mxu0 }
 0x35b   : > { %v3532_v54 = vpop.f32.mrf.mxu1  ;;  %v3531_v37 = vadd.f32 %v3530_v57, %v3460_v31  ;;  %v3462_v33 = vadd.f32 %v3461_v19, %v6065_v2 }
 0x35c   : > { %v3463_v26 = vpop.f32.mrf.mxu0 }
 0x35d   : > { %v3534_v38 = vpop.f32.mrf.mxu1  ;;  %v3533_v60 = vadd.f32 %v3532_v54, %v3462_v33  ;;  %v3464_v21 = vadd.f32 %v3463_v26, %v6067_v20 }
 0x35e   : > { %v3465_v16 = vpop.f32.mrf.mxu0 }
 0x35f   : > { %v3536_v10 = vpop.f32.mrf.mxu1  ;;  %v3535_v27 = vadd.f32 %v3534_v38, %v3464_v21  ;;  %v3466_v45 = vadd.f32 %v3465_v16, %v6073_v62 }
 0x360   : > { %v3469_v52 = vpop.f32.mrf.mxu0 }
 0x361   : > { %v3540_v46 = vpop.f32.mrf.mxu1  ;;  %v3537_v24 = vadd.f32 %v3536_v10, %v3466_v45  ;;  %v3470_v12 = vadd.f32 %v3469_v52, %v6075_v41 }
 0x362   : > { %v3471_v50 = vpop.f32.mrf.mxu0 }
 0x363   : > { %v3542_v51 = vpop.f32.mrf.mxu1  ;;  %v3472_v13 = vadd.f32 %v3471_v50, %v6078_v61  ;;  %v3541_v2 = vadd.f32 %v3540_v46, %v3470_v12 }
 0x364   : > { %v3473_v63 = vpop.f32.mrf.mxu0 }
 0x365   : > { %v3544_v23 = vpop.f32.mrf.mxu1  ;;  %v3474_v18 = vadd.f32 %v3473_v63, %v6082_v9  ;;  %v3543_v20 = vadd.f32 %v3542_v51, %v3472_v13 }
 0x366   : > { %v3475_v8 = vpop.f32.mrf.mxu0 }
 0x367   : > { %v3546_v3 = vpop.f32.mrf.mxu1  ;;  %v3476_v22 = vadd.f32 %v3475_v8, %v6086_v59  ;;  %v3545_v62 = vadd.f32 %v3544_v23, %v3474_v18 }
 0x368   : > { %v3479_v40 = vpop.f32.mrf.mxu0 }
 0x369   : > { %v3550_v29 = vpop.f32.mrf.mxu1  ;;  %v3480_v6 = vadd.f32 %v3479_v40, %v6088_v15  ;;  %v3547_v41 = vadd.f32 %v3546_v3, %v3476_v22 }
 0x36a   : > { %v3481_v34 = vpop.f32.mrf.mxu0 }
 0x36b   : > { %v3552_v36 = vpop.f32.mrf.mxu1  ;;  %v3482_v61 = vadd.f32 %v3481_v34, %v6091_v28  ;;  %v6150_v32 = vadd.f32 %v3550_v29, %v3480_v6 }
 0x36c   : > { %v3483_v49 = vpop.f32.mrf.mxu0 }
 0x36d   : > { %v3554_v5 = vpop.f32.mrf.mxu1  ;;  %v3484_v9 = vadd.f32 %v3483_v49, %v6095_v55  ;;  %v6153_v25 = vadd.f32 %v3552_v36, %v3482_v61 }
 0x36e   : > { %v3485_v44 = vpop.f32.mrf.mxu0 }
 0x36f   : > { %v3556_v59 = vpop.f32.mrf.mxu1  ;;  %v3486_v30 = vadd.f32 %v3485_v44, %v6099_v0  ;;  %v6156_v48 = vadd.f32 %v3554_v5, %v3484_v9 }
 0x370   : > { %v3489_v15 = vpop.f32.mrf.mxu0 }
 0x371   : > { %v3560_v47 = vpop.f32.mrf.mxu1  ;;  %v3490_v14 = vadd.f32 %v3489_v15, %v6101_v1  ;;  %v6159_v43 = vadd.f32 %v3556_v59, %v3486_v30 }
 0x372   : > { %v3491_v28 = vpop.f32.mrf.mxu0 }
 0x373   : > { %v3562_v4 = vpop.f32.mrf.mxu1  ;;  %v3492_v58 = vadd.f32 %v3491_v28, %v6104_v11  ;;  %v6162_v55 = vadd.f32 %v3560_v47, %v3490_v14 }
 0x374   : > { %v3493_v7 = vpop.f32.mrf.mxu0 }
 0x375   : > { %v3564_v17 = vpop.f32.mrf.mxu1  ;;  %v6164_v39 = vadd.f32 %v3562_v4, %v3492_v58 }
 0x376   : > { %v3494_v0 = vpop.f32.mrf.mxu0 }
 0x377   : > { %v3565_v42 = vpop.f32.mrf.mxu1 }
 0x3d8   : > { %v3601_v35 = vpop.f32.mrf.mxu0 }
 0x3d9   : > { %v3672_v53 = vpop.f32.mrf.mxu1  ;;  %v3602_v56 = vadd.f32 %v3601_v35, %v3531_v37  ;;  %v3767_v35 = vld [vmem:[%s5944_s12 + $0x20] sm:$0xff] (%p4976_p4) }
 0x3da   : > { %v3603_v1 = vpop.f32.mrf.mxu0  ;;  %3768 = vst [vmem:[%s6195_s23 + $0x60] sm:$0xff] (%p4976_p4), %v3767_v35 }
 0x3db   : > { %v3674_v57 = vpop.f32.mrf.mxu1  ;;  %v3673_v31 = vadd.f32 %v3672_v53, %v3602_v56  ;;  %v3604_v19 = vadd.f32 %v3603_v1, %v3533_v60  ;;  %v3769_v53 = vld [vmem:[%s5944_s12 + $0x28] sm:$0xff] (%p4976_p4) }
 0x3dc   : > { %v3605_v54 = vpop.f32.mrf.mxu0  ;;  %3770 = vst [vmem:[%s6195_s23 + $0x68] sm:$0xff] (%p4976_p4), %v3769_v53 }
 0x3dd   : > { %v3676_v11 = vpop.f32.mrf.mxu1  ;;  %3711 = vst [vmem:[%s5944_s12 + $0x10] sm:$0xff] %v3673_v31  ;;  %v3675_v33 = vadd.f32 %v3674_v57, %v3604_v19  ;;  %v3606_v26 = vadd.f32 %v3605_v54, %v3535_v27  ;;  %v3775_v57 = vld [vmem:[%s5944_s12 + $0x40] sm:$0xff] (%p4976_p4)  ;;  %v3777_v31 = vld [vmem:[%s5944_s12 + $0x48] sm:$0xff] (%p4976_p4) }
 0x3de   : > { %v3607_v38 = vpop.f32.mrf.mxu0  ;;  %3776 = vst [vmem:[%s6195_s23 + $0xc0] sm:$0xff] (%p4976_p4), %v3775_v57  ;;  %3778 = vst [vmem:[%s6195_s23 + $0xc8] sm:$0xff] (%p4976_p4), %v3777_v31 }
 0x3df   : > { %v3678_v21 = vpop.f32.mrf.mxu1  ;;  %3712 = vst [vmem:[%s5944_s12 + $0x18] sm:$0xff] %v3675_v33  ;;  %v3677_v16 = vadd.f32 %v3676_v11, %v3606_v26  ;;  %v3608_v10 = vadd.f32 %v3607_v38, %v3537_v24  ;;  %v3783_v11 = vld [vmem:[%s5944_s12 + $0x60] sm:$0xff] (%p4976_p4)  ;;  %v3785_v33 = vld [vmem:[%s5944_s12 + $0x68] sm:$0xff] (%p4976_p4) }
 0x3e0   : > { %v3611_v45 = vpop.f32.mrf.mxu0  ;;  %3784 = vst [vmem:[%s6195_s23 + $0x120] sm:$0xff] (%p4976_p4), %v3783_v11  ;;  %3786 = vst [vmem:[%s6195_s23 + $0x128] sm:$0xff] (%p4976_p4), %v3785_v33 }
 0x3e1   : > { %v3682_v52 = vpop.f32.mrf.mxu1  ;;  %3715 = vst [vmem:[%s5944_s12 + $0x30] sm:$0xff] %v3677_v16  ;;  %v3679_v37 = vadd.f32 %v3678_v21, %v3608_v10  ;;  %v3612_v46 = vadd.f32 %v3611_v45, %v3541_v2  ;;  %v3791_v21 = vld [vmem:[%s5944_s12 + $0x80] sm:$0xff] (%p4976_p4)  ;;  %v3793_v16 = vld [vmem:[%s5944_s12 + $0x88] sm:$0xff] (%p4976_p4) }
 0x3e2   : > { %v3613_v12 = vpop.f32.mrf.mxu0  ;;  %3792 = vst [vmem:[%s6195_s23 + $0x180] sm:$0xff] (%p4976_p4), %v3791_v21  ;;  %3794 = vst [vmem:[%s6195_s23 + $0x188] sm:$0xff] (%p4976_p4), %v3793_v16 }
 0x3e3   : > { %v3684_v60 = vpop.f32.mrf.mxu1  ;;  %3716 = vst [vmem:[%s5944_s12 + $0x38] sm:$0xff] %v3679_v37  ;;  %v3683_v50 = vadd.f32 %v3682_v52, %v3612_v46  ;;  %v3614_v51 = vadd.f32 %v3613_v12, %v3543_v20  ;;  %v3799_v52 = vld [vmem:[%s5944_s12 + $0xa0] sm:$0xff] (%p4976_p4)  ;;  %v3801_v37 = vld [vmem:[%s5944_s12 + $0xa8] sm:$0xff] (%p4976_p4) }
 0x3e4   : > { %v3615_v13 = vpop.f32.mrf.mxu0  ;;  %3800 = vst [vmem:[%s6195_s23 + $0x1e0] sm:$0xff] (%p4976_p4), %v3799_v52  ;;  %3802 = vst [vmem:[%s6195_s23 + $0x1e8] sm:$0xff] (%p4976_p4), %v3801_v37 }
 0x3e5   : > { %v3686_v27 = vpop.f32.mrf.mxu1  ;;  %3719 = vst [vmem:[%s5944_s12 + $0x50] sm:$0xff] %v3683_v50  ;;  %v3685_v63 = vadd.f32 %v3684_v60, %v3614_v51  ;;  %v3616_v23 = vadd.f32 %v3615_v13, %v3545_v62  ;;  %v3807_v60 = vld [vmem:[%s5944_s12 + $0xc0] sm:$0xff] (%p4976_p4)  ;;  %v3809_v50 = vld [vmem:[%s5944_s12 + $0xc8] sm:$0xff] (%p4976_p4) }
 0x3e6   : > { %v3617_v18 = vpop.f32.mrf.mxu0  ;;  %v3765_v42 = vld [vmem:[%s5944_s12 + $0x18] sm:$0xff] (%p4976_p4)  ;;  %3808 = vst [vmem:[%s6195_s23 + $0x240] sm:$0xff] (%p4976_p4), %v3807_v60  ;;  %3810 = vst [vmem:[%s6195_s23 + $0x248] sm:$0xff] (%p4976_p4), %v3809_v50 }
 0x3e7   : > { %v3688_v24 = vpop.f32.mrf.mxu1  ;;  %3720 = vst [vmem:[%s5944_s12 + $0x58] sm:$0xff] %v3685_v63  ;;  %v3687_v8 = vadd.f32 %v3686_v27, %v3616_v23  ;;  %v3618_v3 = vadd.f32 %v3617_v18, %v3547_v41  ;;  %3766 = vst [vmem:[%s6195_s23 + $0x18] sm:$0xff] (%p4976_p4), %v3765_v42 }
 0x3e8   : > { %v3621_v22 = vpop.f32.mrf.mxu0  ;;  %v3771_v56 = vld [vmem:[%s5944_s12 + $0x30] sm:$0xff] (%p4976_p4) }
 0x3e9   : > { %v3692_v2 = vpop.f32.mrf.mxu1  ;;  %3723 = vst [vmem:[%s5944_s12 + $0x70] sm:$0xff] %v3687_v8  ;;  %v3689_v40 = vadd.f32 %v3688_v24, %v3618_v3  ;;  %v3622_v29 = vadd.f32 %v3621_v22, %v6150_v32  ;;  %3772 = vst [vmem:[%s6195_s23 + $0x70] sm:$0xff] (%p4976_p4), %v3771_v56 }
 0x3ea   : > { %v3623_v20 = vpop.f32.mrf.mxu0  ;;  %v3773_v1 = vld [vmem:[%s5944_s12 + $0x38] sm:$0xff] (%p4976_p4) }
 0x3eb   : > { %v3694_v6 = vpop.f32.mrf.mxu1  ;;  %3724 = vst [vmem:[%s5944_s12 + $0x78] sm:$0xff] %v3689_v40  ;;  %v3693_v34 = vadd.f32 %v3692_v2, %v3622_v29  ;;  %v3624_v62 = vadd.f32 %v3623_v20, %v6153_v25  ;;  %3774 = vst [vmem:[%s6195_s23 + $0x78] sm:$0xff] (%p4976_p4), %v3773_v1 }
 0x3ec   : > { %v3625_v36 = vpop.f32.mrf.mxu0  ;;  %v3779_v19 = vld [vmem:[%s5944_s12 + $0x50] sm:$0xff] (%p4976_p4) }
 0x3ed   : > { %v3696_v61 = vpop.f32.mrf.mxu1  ;;  %3727 = vst [vmem:[%s5944_s12 + $0x90] sm:$0xff] %v3693_v34  ;;  %v3695_v49 = vadd.f32 %v3694_v6, %v3624_v62  ;;  %v3626_v41 = vadd.f32 %v3625_v36, %v6156_v48  ;;  %3780 = vst [vmem:[%s6195_s23 + $0xd0] sm:$0xff] (%p4976_p4), %v3779_v19 }
 0x3ee   : > { %v3627_v5 = vpop.f32.mrf.mxu0  ;;  %v3781_v54 = vld [vmem:[%s5944_s12 + $0x58] sm:$0xff] (%p4976_p4) }
 0x3ef   : > { %v3698_v9 = vpop.f32.mrf.mxu1  ;;  %3728 = vst [vmem:[%s5944_s12 + $0x98] sm:$0xff] %v3695_v49  ;;  %v3697_v44 = vadd.f32 %v3696_v61, %v3626_v41  ;;  %v3628_v32 = vadd.f32 %v3627_v5, %v6159_v43  ;;  %v3759_v43 = vld [vmem:[%s5944_s12] sm:$0xff] (%p4976_p4)  ;;  %3782 = vst [vmem:[%s6195_s23 + $0xd8] sm:$0xff] (%p4976_p4), %v3781_v54 }
 0x3f0   : > { %v3631_v59 = vpop.f32.mrf.mxu0  ;;  %3760 = vst [vmem:[%s6195_s23] sm:$0xff] (%p4976_p4), %v3759_v43  ;;  %v3787_v26 = vld [vmem:[%s5944_s12 + $0x70] sm:$0xff] (%p4976_p4) }
 0x3f1   : > { %v3702_v30 = vpop.f32.mrf.mxu1  ;;  %3731 = vst [vmem:[%s5944_s12 + $0xb0] sm:$0xff] %v3697_v44  ;;  %v3699_v15 = vadd.f32 %v3698_v9, %v3628_v32  ;;  %v3632_v25 = vadd.f32 %v3631_v59, %v6162_v55  ;;  %v3761_v55 = vld [vmem:[%s5944_s12 + $0x8] sm:$0xff] (%p4976_p4)  ;;  %3788 = vst [vmem:[%s6195_s23 + $0x130] sm:$0xff] (%p4976_p4), %v3787_v26 }
 0x3f2   : > { %v3633_v47 = vpop.f32.mrf.mxu0  ;;  %3762 = vst [vmem:[%s6195_s23 + $0x8] sm:$0xff] (%p4976_p4), %v3761_v55  ;;  %v3789_v38 = vld [vmem:[%s5944_s12 + $0x78] sm:$0xff] (%p4976_p4) }
 0x3f3   : > { %v3704_v14 = vpop.f32.mrf.mxu1  ;;  %3732 = vst [vmem:[%s5944_s12 + $0xb8] sm:$0xff] %v3699_v15  ;;  %v3703_v28 = vadd.f32 %v3702_v30, %v3632_v25  ;;  %v3634_v48 = vadd.f32 %v3633_v47, %v6164_v39  ;;  %3743 = sbr.rel (!%p4976_p4) target bundleno = 1024 (0x400), region = 36  ;;  %v3763_v39 = vld [vmem:[%s5944_s12 + $0x10] sm:$0xff] (%p4976_p4)  ;;  %3790 = vst [vmem:[%s6195_s23 + $0x138] sm:$0xff] (%p4976_p4), %v3789_v38 }
 0x3f4   : > { %v3635_v4 = vpop.f32.mrf.mxu0  ;;  %3764 = vst [vmem:[%s6195_s23 + $0x10] sm:$0xff] (%p4976_p4), %v3763_v39  ;;  %v3795_v10 = vld [vmem:[%s5944_s12 + $0x90] sm:$0xff] (%p4976_p4) }
 0x3f5   : > { %v3706_v58 = vpop.f32.mrf.mxu1  ;;  %3735 = vst [vmem:[%s5944_s12 + $0xd0] sm:$0x1] %v3703_v28  ;;  %v3705_v7 = vadd.f32 %v3704_v14, %v3634_v48  ;;  %3796 = vst [vmem:[%s6195_s23 + $0x190] sm:$0xff] (%p4976_p4), %v3795_v10 }
 0x3f6   : > { %v3636_v17 = vpop.f32.mrf.mxu0  ;;  %v3797_v45 = vld [vmem:[%s5944_s12 + $0x98] sm:$0xff] (%p4976_p4) }
 0x3f7   : > { %v3707_v0 = vpop.f32.mrf.mxu1  ;;  %3736 = vst [vmem:[%s5944_s12 + $0xd8] sm:$0x1] %v3705_v7  ;;  %3798 = vst [vmem:[%s6195_s23 + $0x198] sm:$0xff] (%p4976_p4), %v3797_v45 }
 0x3f8   : > { %v3803_v46 = vld [vmem:[%s5944_s12 + $0xb0] sm:$0xff] }
 0x3f9   : > { %3804 = vst [vmem:[%s6195_s23 + $0x1f0] sm:$0xff] %v3803_v46 }
 0x3fa   : > { %v3805_v12 = vld [vmem:[%s5944_s12 + $0xb8] sm:$0xff] }
 0x3fb   : > { %3806 = vst [vmem:[%s6195_s23 + $0x1f8] sm:$0xff] %v3805_v12 }
 0x3fc   : > { %v3811_v51 = vld [vmem:[%s5944_s12 + $0xd0] sm:$0xff] }
 0x3fd   : > { %3812 = vst [vmem:[%s6195_s23 + $0x250] sm:$0xff] %v3811_v51 }
 0x3fe   : > { %v3813_v13 = vld [vmem:[%s5944_s12 + $0xd8] sm:$0xff] }
 0x3ff   : > { %3814 = vst [vmem:[%s6195_s23 + $0x258] sm:$0xff] %v3813_v13 }
 0x400 PF: > { %p10_p8 = scmp.ge.s32.totalorder %s4966_s16, 5   ;;  %s6311_s12 = smov %s4925_s13 }
 0x401   : > { %s6312_s13 = smov %s4974_s19  ;;  %s6313_s14 = smov %s4966_s16 }
 0x402   :  { %12 = sbr.rel (!%p10_p8) target bundleno = 2 (0x2), region = 85 }

</bundles_post_ra>
